<compile_context>
chip_gen: v5e
topology: v5e:2x2
jax: 0.10.0
libtpu: 0.0.40
codegen_flags: <defaults>
</compile_context>

<pallas_src>
import math
import functools

import jax
import jax.numpy as jnp
from jax.experimental import pallas as pl
from jax.experimental.pallas import tpu as pltpu


_VMEM_LIMIT = 48 * 1024 * 1024  # raised scoped-VMEM limit; fits v5e/v6e/v7x physical VMEM


def _pick_tile(dim, target, align):
    """Largest tile <= target that is a multiple of `align` and divides `dim`,
    falling back to the full dim (full-block exception to the (8,128) rule)."""
    if dim <= target or dim % align != 0:
        return dim
    t = (target // align) * align
    while t >= align:
        if dim % t == 0:
            return t
        t -= align
    return dim


# ---------------- Pallas kernels ----------------

def _matmul_kernel(x_ref, w_ref, b_ref, o_ref, acc_ref, *, relu):
    """Tiled X @ W with bf16 MXU operands, f32 accumulation, bias(+ReLU) epilogue."""
    k = pl.program_id(2)

    @pl.when(k == 0)
    def _():
        acc_ref[...] = jnp.zeros_like(acc_ref)

    acc_ref[...] += jnp.dot(
        x_ref[...].astype(jnp.bfloat16),
        w_ref[...].astype(jnp.bfloat16),
        preferred_element_type=jnp.float32,
    )

    @pl.when(k == pl.num_programs(2) - 1)
    def _():
        y = acc_ref[...] + b_ref[...]
        if relu:
            y = jnp.maximum(y, 0.0)
        o_ref[...] = y.astype(o_ref.dtype)


def _matmul_res_ln_kernel(x_ref, w_ref, b_ref, r_ref, g_ref, bln_ref, o_ref, acc_ref, *, eps):
    """Tiled X @ W with fused (bias + residual + LayerNorm) epilogue (full N per block)."""
    k = pl.program_id(1)

    @pl.when(k == 0)
    def _():
        acc_ref[...] = jnp.zeros_like(acc_ref)

    acc_ref[...] += jnp.dot(
        x_ref[...].astype(jnp.bfloat16),
        w_ref[...].astype(jnp.bfloat16),
        preferred_element_type=jnp.float32,
    )

    @pl.when(k == pl.num_programs(1) - 1)
    def _():
        y = acc_ref[...] + b_ref[...] + r_ref[...]
        mu = jnp.mean(y, axis=-1, keepdims=True)
        var = jnp.mean(jnp.square(y - mu), axis=-1, keepdims=True)
        o_ref[...] = ((y - mu) * jax.lax.rsqrt(var + eps) * g_ref[...]
                      + bln_ref[...]).astype(o_ref.dtype)


def _ln_kernel(x_ref, g_ref, b_ref, o_ref, *, eps):
    x = x_ref[...]
    mu = jnp.mean(x, axis=-1, keepdims=True)
    var = jnp.mean(jnp.square(x - mu), axis=-1, keepdims=True)
    o_ref[...] = (x - mu) * jax.lax.rsqrt(var + eps) * g_ref[...] + b_ref[...]


def _attn_kernel(q_ref, kv_ref, o_ref, *, H, Dh, d_model, scale):
    """Cross-attention for one batch element, all heads, (S, H*Dh) layout in/out.

    Loads q (S, d_model) and packed kv (S, 2*d_model) once, slices heads in-register,
    and stores one lane-dense (S, d_model) block.
    """
    # TODO(synk): for long sequences (S >> 1k) switch to flash-style K/V tiling with an
    # online softmax instead of materializing the (S, S) score matrix per head.
    q_all = q_ref[0]          # (S, d_model)   f32
    kv_all = kv_ref[0]        # (S, 2*d_model) f32
    outs = []
    for h in range(H):
        qh = q_all[:, h * Dh:(h + 1) * Dh].astype(jnp.bfloat16)               # (S, Dh)
        kh = kv_all[:, h * Dh:(h + 1) * Dh].astype(jnp.bfloat16)              # (S, Dh)
        vh = kv_all[:, d_model + h * Dh:d_model + (h + 1) * Dh].astype(jnp.bfloat16)
        s = jnp.dot(qh, kh.T, preferred_element_type=jnp.float32) * scale     # (S, S) f32
        m = jnp.max(s, axis=-1, keepdims=True)
        p = jnp.exp(s - m)
        inv = pl.reciprocal(jnp.sum(p, axis=-1, keepdims=True), approx=True)  # EUP slot
        p = p * inv
        outs.append(jnp.dot(p.astype(jnp.bfloat16), vh,
                            preferred_element_type=jnp.float32))              # (S, Dh)
    o_ref[0] = jnp.concatenate(outs, axis=-1)                                 # (S, d_model)


# ---------------- Pallas wrappers ----------------

def linear(x, w, b, relu=False, tm=256, tn=512, tk=512):
    """x: (M, K) @ w: (K, N) + b: (N,) -> (M, N), tiled with f32 VMEM accumulator."""
    M, K = x.shape
    _, N = w.shape
    tm = _pick_tile(M, tm, 8)
    tn = _pick_tile(N, tn, 128)
    tk = _pick_tile(K, tk, 128)
    grid = (M // tm, N // tn, K // tk)
    return pl.pallas_call(
        functools.partial(_matmul_kernel, relu=relu),
        grid=grid,
        out_shape=jax.ShapeDtypeStruct((M, N), jnp.float32),
        in_specs=[
            pl.BlockSpec((tm, tk), lambda i, j, k: (i, k)),
            pl.BlockSpec((tk, tn), lambda i, j, k: (k, j)),
            pl.BlockSpec((1, tn), lambda i, j, k: (0, j)),
        ],
        out_specs=pl.BlockSpec((tm, tn), lambda i, j, k: (i, j)),
        scratch_shapes=[pltpu.VMEM((tm, tn), jnp.float32)],
        compiler_params=pltpu.CompilerParams(
            dimension_semantics=("parallel", "parallel", "arbitrary"),
            vmem_limit_bytes=_VMEM_LIMIT,
        ),
    )(x, w, b.reshape(1, N))


def linear_residual_ln(x, w, b, residual, gamma, beta, eps=1e-5, tm=256, tk=256):
    """LayerNorm(residual + x @ w + b): matmul with fused residual+LN epilogue.

    The LN reduction needs the whole feature dim, so N is kept as one block."""
    M, K = x.shape
    _, N = w.shape
    tm = _pick_tile(M, tm, 8)
    tk = _pick_tile(K, tk, 128)
    grid = (M // tm, K // tk)
    return pl.pallas_call(
        functools.partial(_matmul_res_ln_kernel, eps=eps),
        grid=grid,
        out_shape=jax.ShapeDtypeStruct((M, N), jnp.float32),
        in_specs=[
            pl.BlockSpec((tm, tk), lambda i, k: (i, k)),
            pl.BlockSpec((tk, N), lambda i, k: (k, 0)),
            pl.BlockSpec((1, N), lambda i, k: (0, 0)),
            pl.BlockSpec((tm, N), lambda i, k: (i, 0)),
            pl.BlockSpec((1, N), lambda i, k: (0, 0)),
            pl.BlockSpec((1, N), lambda i, k: (0, 0)),
        ],
        out_specs=pl.BlockSpec((tm, N), lambda i, k: (i, 0)),
        scratch_shapes=[pltpu.VMEM((tm, N), jnp.float32)],
        compiler_params=pltpu.CompilerParams(
            dimension_semantics=("parallel", "arbitrary"),
            vmem_limit_bytes=_VMEM_LIMIT,
        ),
    )(x, w, b.reshape(1, N), residual, gamma.reshape(1, N), beta.reshape(1, N))


def layer_norm(x, g, b, eps=1e-5, tm=256):
    M, D = x.shape
    tm = _pick_tile(M, tm, 8)
    return pl.pallas_call(
        functools.partial(_ln_kernel, eps=eps),
        grid=(M // tm,),
        out_shape=jax.ShapeDtypeStruct((M, D), jnp.float32),
        in_specs=[pl.BlockSpec((tm, D), lambda i: (i, 0)),
                  pl.BlockSpec((1, D), lambda i: (0, 0)),
                  pl.BlockSpec((1, D), lambda i: (0, 0))],
        out_specs=pl.BlockSpec((tm, D), lambda i: (i, 0)),
        compiler_params=pltpu.CompilerParams(
            dimension_semantics=("parallel",),
            vmem_limit_bytes=_VMEM_LIMIT,
        ),
    )(x, g.reshape(1, D), b.reshape(1, D))


def attention(q, kv, B, S, H, Dh):
    """q: (B*S, d_model) query projections; kv: (B*S, 2*d_model) packed key|value
    projections.  Returns (B*S, d_model).  No JAX-level head transposes."""
    d_model = H * Dh
    q3 = q.reshape(B, S, d_model)
    kv3 = kv.reshape(B, S, 2 * d_model)
    scale = 1.0 / math.sqrt(Dh)
    out = pl.pallas_call(
        functools.partial(_attn_kernel, H=H, Dh=Dh, d_model=d_model, scale=scale),
        grid=(B,),
        out_shape=jax.ShapeDtypeStruct((B, S, d_model), jnp.float32),
        in_specs=[pl.BlockSpec((1, S, d_model), lambda b: (b, 0, 0)),
                  pl.BlockSpec((1, S, 2 * d_model), lambda b: (b, 0, 0))],
        out_specs=pl.BlockSpec((1, S, d_model), lambda b: (b, 0, 0)),
        compiler_params=pltpu.CompilerParams(
            dimension_semantics=("parallel",),
            vmem_limit_bytes=_VMEM_LIMIT,
        ),
    )(q3, kv3)
    return out.reshape(B * S, d_model)


# ---------------- model forward ----------------

def encoder_layer_forward(out, mem, lp, B, S, H, Dh):
    # cross-attention: Q from `out`, packed K|V from `mem` (one fused matmul)
    q = linear(out, lp["wq"], lp["bq"])
    kv = linear(mem, lp["w_kv"], lp["b_kv"])
    attn = attention(q, kv, B, S, H, Dh)
    # output projection with fused (residual + LN1) epilogue
    out = linear_residual_ln(attn, lp["wo"], lp["bo"], out, lp["ln1_g"], lp["ln1_b"])
    # FFN; w2 matmul with fused (residual + LN2) epilogue
    h = linear(out, lp["w1"], lp["b1"], relu=True)
    out = linear_residual_ln(h, lp["w2"], lp["b2"], out, lp["ln2_g"], lp["ln2_b"])
    return out


def transformer_encoder(src, params, B, S, H, Dh):
    d_model = H * Dh
    x = src.reshape(B * S, -1)
    # fused (query_encoder_embedding | key_value_embedding): one matmul, then split
    qm = linear(x, params["emb_w"], params["emb_b"])          # (B*S, 2*d_model)
    out = qm[:, :d_model]
    mem = qm[:, d_model:]
    for lp in params["layers"]:
        out = encoder_layer_forward(out, mem, lp, B, S, H, Dh)
    out = layer_norm(out, params["norm_g"], params["norm_b"])  # final norm
    return out.reshape(B, S, d_model)


# ---------------- deterministic parameter init ----------------

def _lin_init(key, fan_in, fan_out):
    kw, kb = jax.random.split(key)
    bound = 1.0 / math.sqrt(fan_in)
    w = jax.random.uniform(kw, (fan_in, fan_out), jnp.float32, -bound, bound)
    b = jax.random.uniform(kb, (fan_out,), jnp.float32, -bound, bound)
    return w, b


def init_params(key, d_in, d_model, d_ffn, num_layers):
    k_q, k_kv, *k_layers = jax.random.split(key, 2 + num_layers)
    emb_q_w, emb_q_b = _lin_init(k_q, d_in, d_model)
    emb_kv_w, emb_kv_b = _lin_init(k_kv, d_in, d_model)
    layers = []
    for kl in k_layers:
        kq, kk, kv, ko, k1, k2 = jax.random.split(kl, 6)
        wq, bq = _lin_init(kq, d_model, d_model)
        wk, bk = _lin_init(kk, d_model, d_model)
        wv, bv = _lin_init(kv, d_model, d_model)
        wo, bo = _lin_init(ko, d_model, d_model)
        w1, b1 = _lin_init(k1, d_model, d_ffn)
        w2, b2 = _lin_init(k2, d_ffn, d_model)
        layers.append({
            "wq": wq, "bq": bq,
            # K and V projections act on the same input (mem): fuse their weights
            "w_kv": jnp.concatenate([wk, wv], axis=1),
            "b_kv": jnp.concatenate([bk, bv], axis=0),
            "wo": wo, "bo": bo,
            "w1": w1, "b1": b1, "w2": w2, "b2": b2,
            "ln1_g": jnp.ones((d_model,), jnp.float32),
            "ln1_b": jnp.zeros((d_model,), jnp.float32),
            "ln2_g": jnp.ones((d_model,), jnp.float32),
            "ln2_b": jnp.zeros((d_model,), jnp.float32),
        })
    return {
        # query embedding and key/value embedding share the input src: fuse their weights
        "emb_w": jnp.concatenate([emb_q_w, emb_kv_w], axis=1),
        "emb_b": jnp.concatenate([emb_q_b, emb_kv_b], axis=0),
        "layers": layers,
        "norm_g": jnp.ones((d_model,), jnp.float32),
        "norm_b": jnp.zeros((d_model,), jnp.float32),
    }


if __name__ == "__main__":
    B, S, D_IN, D_MODEL, H, D_FFN, NUM_LAYERS = 2, 8, 16, 32, 4, 64, 2
    Dh = D_MODEL // H

    key = jax.random.PRNGKey(0)
    kp, kx = jax.random.split(key)
    params = init_params(kp, D_IN, D_MODEL, D_FFN, NUM_LAYERS)
    src = jax.random.normal(kx, (B, S, D_IN), jnp.float32)

    fwd = jax.jit(transformer_encoder, static_argnums=(2, 3, 4, 5))
    out = fwd(src, params, B, S, H, Dh)
    out = jax.block_until_ready(out)

    assert out.shape == (B, S, D_MODEL), out.shape
    assert bool(jnp.all(jnp.isfinite(out)))
    print("KERNEL_OK")
</pallas_src>

<mosaic_0001>
module attributes {stable_mosaic.version = 11 : i64} {
  func.func @_matmul_kernel(%arg0: i32, %arg1: i32, %arg2: i32, %arg3: memref<16x32xf32, #tpu.memory_space<vmem>>, %arg4: memref<32x64xf32, #tpu.memory_space<vmem>>, %arg5: memref<1x64xf32, #tpu.memory_space<vmem>>, %arg6: memref<16x64xf32, #tpu.memory_space<vmem>>, %arg7: memref<16x64xf32, #tpu.memory_space<vmem>>) attributes {dimension_semantics = [#tpu.dimension_semantics<parallel>, #tpu.dimension_semantics<parallel>, #tpu.dimension_semantics<arbitrary>], iteration_bounds = array<i64: 1, 1, 1>, scalar_prefetch = 0 : i64, scratch_operands = 1 : i64, tpu.core_type = #tpu.core_type<tc>, window_params = [{transform_indices = @transform_0, window_bounds = array<i64: 16, 32>}, {transform_indices = @transform_1, window_bounds = array<i64: 32, 64>}, {transform_indices = @transform_2, window_bounds = array<i64: 1, 64>}, {transform_indices = @transform_3, window_bounds = array<i64: 16, 64>}]} {
    %c0_i32 = arith.constant 0 : i32
    %0 = arith.cmpi eq, %arg2, %c0_i32 : i32
    %1 = arith.extui %0 : i1 to i32
    %c0_i32_0 = arith.constant 0 : i32
    %2 = arith.cmpi ne, %1, %c0_i32_0 : i32
    scf.if %2 {
      %cst_10 = arith.constant 0.000000e+00 : f32
      %14 = vector.broadcast %cst_10 : f32 to vector<16x64xf32>
      %c0_11 = arith.constant 0 : index
      %c0_12 = arith.constant 0 : index
      %15 = vector.load %arg7[%c0_11, %c0_12] : memref<16x64xf32, #tpu.memory_space<vmem>>, vector<16x64xf32>
      tpu.vector_store %arg7[%c0_11, %c0_12], %14 {strides = array<i32>} : memref<16x64xf32, #tpu.memory_space<vmem>>, vector<16x64xf32>,
    } else {
    }
    %c0 = arith.constant 0 : index
    %c0_1 = arith.constant 0 : index
    %3 = vector.load %arg7[%c0, %c0_1] : memref<16x64xf32, #tpu.memory_space<vmem>>, vector<16x64xf32>
    %c0_2 = arith.constant 0 : index
    %c0_3 = arith.constant 0 : index
    %4 = vector.load %arg3[%c0_2, %c0_3] : memref<16x32xf32, #tpu.memory_space<vmem>>, vector<16x32xf32>
    %5 = arith.truncf %4 : vector<16x32xf32> to vector<16x32xbf16>
    %c0_4 = arith.constant 0 : index
    %c0_5 = arith.constant 0 : index
    %6 = vector.load %arg4[%c0_4, %c0_5] : memref<32x64xf32, #tpu.memory_space<vmem>>, vector<32x64xf32>
    %7 = arith.truncf %6 : vector<32x64xf32> to vector<32x64xbf16>
    %cst = arith.constant dense<0.000000e+00> : vector<16x64xf32>
    %8 = tpu.matmul %5, %7, %cst {dimension_numbers = #tpu.dot_dimension_numbers<[1], [0], [0], [1], [0, 0, 1, 1], [], []>} : vector<16x32xbf16>, vector<32x64xbf16>, vector<16x64xf32> -> vector<16x64xf32>
    %9 = arith.addf %3, %8 : vector<16x64xf32>
    %c0_6 = arith.constant 0 : index
    %c0_7 = arith.constant 0 : index
    %10 = vector.load %arg7[%c0_6, %c0_7] : memref<16x64xf32, #tpu.memory_space<vmem>>, vector<16x64xf32>
    tpu.vector_store %arg7[%c0_6, %c0_7], %9 {strides = array<i32>} : memref<16x64xf32, #tpu.memory_space<vmem>>, vector<16x64xf32>,
    %c0_i32_8 = arith.constant 0 : i32
    %11 = arith.cmpi eq, %arg2, %c0_i32_8 : i32
    %12 = arith.extui %11 : i1 to i32
    %c0_i32_9 = arith.constant 0 : i32
    %13 = arith.cmpi ne, %12, %c0_i32_9 : i32
    scf.if %13 {
      %c0_10 = arith.constant 0 : index
      %c0_11 = arith.constant 0 : index
      %14 = vector.load %arg7[%c0_10, %c0_11] : memref<16x64xf32, #tpu.memory_space<vmem>>, vector<16x64xf32>
      %c0_12 = arith.constant 0 : index
      %c0_13 = arith.constant 0 : index
      %15 = vector.load %arg5[%c0_12, %c0_13] : memref<1x64xf32, #tpu.memory_space<vmem>>, vector<1x64xf32>
      %16 = vector.broadcast %15 : vector<1x64xf32> to vector<16x64xf32>
      %17 = arith.addf %14, %16 : vector<16x64xf32>
      %c0_14 = arith.constant 0 : index
      %c0_15 = arith.constant 0 : index
      %18 = vector.load %arg6[%c0_14, %c0_15] : memref<16x64xf32, #tpu.memory_space<vmem>>, vector<16x64xf32>
      tpu.vector_store %arg6[%c0_14, %c0_15], %17 {strides = array<i32>} : memref<16x64xf32, #tpu.memory_space<vmem>>, vector<16x64xf32>,
    } else {
    }
    return
  }
  func.func @transform_0(%arg0: i32, %arg1: i32, %arg2: i32) -> (i32, i32) {
    %c0_i32 = arith.constant 0 : i32
    return %arg0, %arg2 : i32, i32
  }
  func.func @transform_1(%arg0: i32, %arg1: i32, %arg2: i32) -> (i32, i32) {
    %c0_i32 = arith.constant 0 : i32
    return %arg2, %arg1 : i32, i32
  }
  func.func @transform_2(%arg0: i32, %arg1: i32, %arg2: i32) -> (i32, i32) {
    %c0_i32 = arith.constant 0 : i32
    %c0_i32_0 = arith.constant 0 : i32
    return %c0_i32, %arg1 : i32, i32
  }
  func.func @transform_3(%arg0: i32, %arg1: i32, %arg2: i32) -> (i32, i32) {
    %c0_i32 = arith.constant 0 : i32
    return %arg0, %arg1 : i32, i32
  }
}

module attributes {stable_mosaic.version = 11 : i64} {
  func.func @_matmul_kernel(%arg0: i32, %arg1: i32, %arg2: i32, %arg3: memref<16x16xf32, #tpu.memory_space<vmem>>, %arg4: memref<16x64xf32, #tpu.memory_space<vmem>>, %arg5: memref<1x64xf32, #tpu.memory_space<vmem>>, %arg6: memref<16x64xf32, #tpu.memory_space<vmem>>, %arg7: memref<16x64xf32, #tpu.memory_space<vmem>>) attributes {dimension_semantics = [#tpu.dimension_semantics<parallel>, #tpu.dimension_semantics<parallel>, #tpu.dimension_semantics<arbitrary>], iteration_bounds = array<i64: 1, 1, 1>, scalar_prefetch = 0 : i64, scratch_operands = 1 : i64, tpu.core_type = #tpu.core_type<tc>, window_params = [{transform_indices = @transform_0, window_bounds = array<i64: 16, 16>}, {transform_indices = @transform_1, window_bounds = array<i64: 16, 64>}, {transform_indices = @transform_2, window_bounds = array<i64: 1, 64>}, {transform_indices = @transform_3, window_bounds = array<i64: 16, 64>}]} {
    %c0_i32 = arith.constant 0 : i32
    %0 = arith.cmpi eq, %arg2, %c0_i32 : i32
    %1 = arith.extui %0 : i1 to i32
    %c0_i32_0 = arith.constant 0 : i32
    %2 = arith.cmpi ne, %1, %c0_i32_0 : i32
    scf.if %2 {
      %cst_10 = arith.constant 0.000000e+00 : f32
      %14 = vector.broadcast %cst_10 : f32 to vector<16x64xf32>
      %c0_11 = arith.constant 0 : index
      %c0_12 = arith.constant 0 : index
      %15 = vector.load %arg7[%c0_11, %c0_12] : memref<16x64xf32, #tpu.memory_space<vmem>>, vector<16x64xf32>
      tpu.vector_store %arg7[%c0_11, %c0_12], %14 {strides = array<i32>} : memref<16x64xf32, #tpu.memory_space<vmem>>, vector<16x64xf32>,
    } else {
    }
    %c0 = arith.constant 0 : index
    %c0_1 = arith.constant 0 : index
    %3 = vector.load %arg7[%c0, %c0_1] : memref<16x64xf32, #tpu.memory_space<vmem>>, vector<16x64xf32>
    %c0_2 = arith.constant 0 : index
    %c0_3 = arith.constant 0 : index
    %4 = vector.load %arg3[%c0_2, %c0_3] : memref<16x16xf32, #tpu.memory_space<vmem>>, vector<16x16xf32>
    %5 = arith.truncf %4 : vector<16x16xf32> to vector<16x16xbf16>
    %c0_4 = arith.constant 0 : index
    %c0_5 = arith.constant 0 : index
    %6 = vector.load %arg4[%c0_4, %c0_5] : memref<16x64xf32, #tpu.memory_space<vmem>>, vector<16x64xf32>
    %7 = arith.truncf %6 : vector<16x64xf32> to vector<16x64xbf16>
    %cst = arith.constant dense<0.000000e+00> : vector<16x64xf32>
    %8 = tpu.matmul %5, %7, %cst {dimension_numbers = #tpu.dot_dimension_numbers<[1], [0], [0], [1], [0, 0, 1, 1], [], []>} : vector<16x16xbf16>, vector<16x64xbf16>, vector<16x64xf32> -> vector<16x64xf32>
    %9 = arith.addf %3, %8 : vector<16x64xf32>
    %c0_6 = arith.constant 0 : index
    %c0_7 = arith.constant 0 : index
    %10 = vector.load %arg7[%c0_6, %c0_7] : memref<16x64xf32, #tpu.memory_space<vmem>>, vector<16x64xf32>
    tpu.vector_store %arg7[%c0_6, %c0_7], %9 {strides = array<i32>} : memref<16x64xf32, #tpu.memory_space<vmem>>, vector<16x64xf32>,
    %c0_i32_8 = arith.constant 0 : i32
    %11 = arith.cmpi eq, %arg2, %c0_i32_8 : i32
    %12 = arith.extui %11 : i1 to i32
    %c0_i32_9 = arith.constant 0 : i32
    %13 = arith.cmpi ne, %12, %c0_i32_9 : i32
    scf.if %13 {
      %c0_10 = arith.constant 0 : index
      %c0_11 = arith.constant 0 : index
      %14 = vector.load %arg7[%c0_10, %c0_11] : memref<16x64xf32, #tpu.memory_space<vmem>>, vector<16x64xf32>
      %c0_12 = arith.constant 0 : index
      %c0_13 = arith.constant 0 : index
      %15 = vector.load %arg5[%c0_12, %c0_13] : memref<1x64xf32, #tpu.memory_space<vmem>>, vector<1x64xf32>
      %16 = vector.broadcast %15 : vector<1x64xf32> to vector<16x64xf32>
      %17 = arith.addf %14, %16 : vector<16x64xf32>
      %c0_14 = arith.constant 0 : index
      %c0_15 = arith.constant 0 : index
      %18 = vector.load %arg6[%c0_14, %c0_15] : memref<16x64xf32, #tpu.memory_space<vmem>>, vector<16x64xf32>
      tpu.vector_store %arg6[%c0_14, %c0_15], %17 {strides = array<i32>} : memref<16x64xf32, #tpu.memory_space<vmem>>, vector<16x64xf32>,
    } else {
    }
    return
  }
  func.func @transform_0(%arg0: i32, %arg1: i32, %arg2: i32) -> (i32, i32) {
    %c0_i32 = arith.constant 0 : i32
    return %arg0, %arg2 : i32, i32
  }
  func.func @transform_1(%arg0: i32, %arg1: i32, %arg2: i32) -> (i32, i32) {
    %c0_i32 = arith.constant 0 : i32
    return %arg2, %arg1 : i32, i32
  }
  func.func @transform_2(%arg0: i32, %arg1: i32, %arg2: i32) -> (i32, i32) {
    %c0_i32 = arith.constant 0 : i32
    %c0_i32_0 = arith.constant 0 : i32
    return %c0_i32, %arg1 : i32, i32
  }
  func.func @transform_3(%arg0: i32, %arg1: i32, %arg2: i32) -> (i32, i32) {
    %c0_i32 = arith.constant 0 : i32
    return %arg0, %arg1 : i32, i32
  }
}

module attributes {stable_mosaic.version = 11 : i64} {
  func.func @_matmul_kernel(%arg0: i32, %arg1: i32, %arg2: i32, %arg3: memref<16x32xf32, #tpu.memory_space<vmem>>, %arg4: memref<32x32xf32, #tpu.memory_space<vmem>>, %arg5: memref<1x32xf32, #tpu.memory_space<vmem>>, %arg6: memref<16x32xf32, #tpu.memory_space<vmem>>, %arg7: memref<16x32xf32, #tpu.memory_space<vmem>>) attributes {dimension_semantics = [#tpu.dimension_semantics<parallel>, #tpu.dimension_semantics<parallel>, #tpu.dimension_semantics<arbitrary>], iteration_bounds = array<i64: 1, 1, 1>, scalar_prefetch = 0 : i64, scratch_operands = 1 : i64, tpu.core_type = #tpu.core_type<tc>, window_params = [{transform_indices = @transform_0, window_bounds = array<i64: 16, 32>}, {transform_indices = @transform_1, window_bounds = array<i64: 32, 32>}, {transform_indices = @transform_2, window_bounds = array<i64: 1, 32>}, {transform_indices = @transform_3, window_bounds = array<i64: 16, 32>}]} {
    %c0_i32 = arith.constant 0 : i32
    %0 = arith.cmpi eq, %arg2, %c0_i32 : i32
    %1 = arith.extui %0 : i1 to i32
    %c0_i32_0 = arith.constant 0 : i32
    %2 = arith.cmpi ne, %1, %c0_i32_0 : i32
    scf.if %2 {
      %cst_10 = arith.constant 0.000000e+00 : f32
      %14 = vector.broadcast %cst_10 : f32 to vector<16x32xf32>
      %c0_11 = arith.constant 0 : index
      %c0_12 = arith.constant 0 : index
      %15 = vector.load %arg7[%c0_11, %c0_12] : memref<16x32xf32, #tpu.memory_space<vmem>>, vector<16x32xf32>
      tpu.vector_store %arg7[%c0_11, %c0_12], %14 {strides = array<i32>} : memref<16x32xf32, #tpu.memory_space<vmem>>, vector<16x32xf32>,
    } else {
    }
    %c0 = arith.constant 0 : index
    %c0_1 = arith.constant 0 : index
    %3 = vector.load %arg7[%c0, %c0_1] : memref<16x32xf32, #tpu.memory_space<vmem>>, vector<16x32xf32>
    %c0_2 = arith.constant 0 : index
    %c0_3 = arith.constant 0 : index
    %4 = vector.load %arg3[%c0_2, %c0_3] : memref<16x32xf32, #tpu.memory_space<vmem>>, vector<16x32xf32>
    %5 = arith.truncf %4 : vector<16x32xf32> to vector<16x32xbf16>
    %c0_4 = arith.constant 0 : index
    %c0_5 = arith.constant 0 : index
    %6 = vector.load %arg4[%c0_4, %c0_5] : memref<32x32xf32, #tpu.memory_space<vmem>>, vector<32x32xf32>
    %7 = arith.truncf %6 : vector<32x32xf32> to vector<32x32xbf16>
    %cst = arith.constant dense<0.000000e+00> : vector<16x32xf32>
    %8 = tpu.matmul %5, %7, %cst {dimension_numbers = #tpu.dot_dimension_numbers<[1], [0], [0], [1], [0, 0, 1, 1], [], []>} : vector<16x32xbf16>, vector<32x32xbf16>, vector<16x32xf32> -> vector<16x32xf32>
    %9 = arith.addf %3, %8 : vector<16x32xf32>
    %c0_6 = arith.constant 0 : index
    %c0_7 = arith.constant 0 : index
    %10 = vector.load %arg7[%c0_6, %c0_7] : memref<16x32xf32, #tpu.memory_space<vmem>>, vector<16x32xf32>
    tpu.vector_store %arg7[%c0_6, %c0_7], %9 {strides = array<i32>} : memref<16x32xf32, #tpu.memory_space<vmem>>, vector<16x32xf32>,
    %c0_i32_8 = arith.constant 0 : i32
    %11 = arith.cmpi eq, %arg2, %c0_i32_8 : i32
    %12 = arith.extui %11 : i1 to i32
    %c0_i32_9 = arith.constant 0 : i32
    %13 = arith.cmpi ne, %12, %c0_i32_9 : i32
    scf.if %13 {
      %c0_10 = arith.constant 0 : index
      %c0_11 = arith.constant 0 : index
      %14 = vector.load %arg7[%c0_10, %c0_11] : memref<16x32xf32, #tpu.memory_space<vmem>>, vector<16x32xf32>
      %c0_12 = arith.constant 0 : index
      %c0_13 = arith.constant 0 : index
      %15 = vector.load %arg5[%c0_12, %c0_13] : memref<1x32xf32, #tpu.memory_space<vmem>>, vector<1x32xf32>
      %16 = vector.broadcast %15 : vector<1x32xf32> to vector<16x32xf32>
      %17 = arith.addf %14, %16 : vector<16x32xf32>
      %c0_14 = arith.constant 0 : index
      %c0_15 = arith.constant 0 : index
      %18 = vector.load %arg6[%c0_14, %c0_15] : memref<16x32xf32, #tpu.memory_space<vmem>>, vector<16x32xf32>
      tpu.vector_store %arg6[%c0_14, %c0_15], %17 {strides = array<i32>} : memref<16x32xf32, #tpu.memory_space<vmem>>, vector<16x32xf32>,
    } else {
    }
    return
  }
  func.func @transform_0(%arg0: i32, %arg1: i32, %arg2: i32) -> (i32, i32) {
    %c0_i32 = arith.constant 0 : i32
    return %arg0, %arg2 : i32, i32
  }
  func.func @transform_1(%arg0: i32, %arg1: i32, %arg2: i32) -> (i32, i32) {
    %c0_i32 = arith.constant 0 : i32
    return %arg2, %arg1 : i32, i32
  }
  func.func @transform_2(%arg0: i32, %arg1: i32, %arg2: i32) -> (i32, i32) {
    %c0_i32 = arith.constant 0 : i32
    %c0_i32_0 = arith.constant 0 : i32
    return %c0_i32, %arg1 : i32, i32
  }
  func.func @transform_3(%arg0: i32, %arg1: i32, %arg2: i32) -> (i32, i32) {
    %c0_i32 = arith.constant 0 : i32
    return %arg0, %arg1 : i32, i32
  }
}

module attributes {stable_mosaic.version = 11 : i64} {
  func.func @_attn_kernel(%arg0: i32, %arg1: memref<1x8x32xf32, #tpu.memory_space<vmem>>, %arg2: memref<1x8x64xf32, #tpu.memory_space<vmem>>, %arg3: memref<1x8x32xf32, #tpu.memory_space<vmem>>) attributes {dimension_semantics = [#tpu.dimension_semantics<parallel>], iteration_bounds = array<i64: 2>, scalar_prefetch = 0 : i64, scratch_operands = 0 : i64, tpu.core_type = #tpu.core_type<tc>, window_params = [{transform_indices = @transform_0, window_bounds = array<i64: 1, 8, 32>}, {transform_indices = @transform_1, window_bounds = array<i64: 1, 8, 64>}, {transform_indices = @transform_2, window_bounds = array<i64: 1, 8, 32>}]} {
    %c0 = arith.constant 0 : index
    %c0_0 = arith.constant 0 : index
    %c0_1 = arith.constant 0 : index
    %0 = vector.load %arg1[%c0, %c0_0, %c0_1] : memref<1x8x32xf32, #tpu.memory_space<vmem>>, vector<1x8x32xf32>
    %1 = vector.shape_cast %0 : vector<1x8x32xf32> to vector<8x32xf32>
    %c0_2 = arith.constant 0 : index
    %c0_3 = arith.constant 0 : index
    %c0_4 = arith.constant 0 : index
    %2 = vector.load %arg2[%c0_2, %c0_3, %c0_4] : memref<1x8x64xf32, #tpu.memory_space<vmem>>, vector<1x8x64xf32>
    %3 = vector.shape_cast %2 : vector<1x8x64xf32> to vector<8x64xf32>
    %4 = vector.extract_strided_slice %1 {offsets = [0, 0], sizes = [8, 8], strides = [1, 1]} : vector<8x32xf32> to vector<8x8xf32>
    %5 = arith.truncf %4 : vector<8x8xf32> to vector<8x8xbf16>
    %6 = vector.extract_strided_slice %3 {offsets = [0, 0], sizes = [8, 8], strides = [1, 1]} : vector<8x64xf32> to vector<8x8xf32>
    %7 = arith.truncf %6 : vector<8x8xf32> to vector<8x8xbf16>
    %8 = vector.extract_strided_slice %3 {offsets = [0, 32], sizes = [8, 8], strides = [1, 1]} : vector<8x64xf32> to vector<8x8xf32>
    %9 = arith.truncf %8 : vector<8x8xf32> to vector<8x8xbf16>
    %10 = tpu.transpose %7, [1, 0] : vector<8x8xbf16> -> vector<8x8xbf16>
    %cst = arith.constant dense<0.000000e+00> : vector<8x8xf32>
    %11 = tpu.matmul %5, %10, %cst {dimension_numbers = #tpu.dot_dimension_numbers<[1], [0], [0], [1], [0, 0, 1, 1], [], []>} : vector<8x8xbf16>, vector<8x8xbf16>, vector<8x8xf32> -> vector<8x8xf32>
    %cst_5 = arith.constant 0.353553385 : f32
    %12 = vector.broadcast %cst_5 : f32 to vector<8x8xf32>
    %13 = arith.mulf %11, %12 : vector<8x8xf32>
    %cst_6 = arith.constant dense<0xFF800000> : vector<8xf32>
    %14 = vector.multi_reduction <maximumf>, %13, %cst_6 [1] : vector<8x8xf32> to vector<8xf32>
    %15 = vector.shape_cast %14 : vector<8xf32> to vector<8x1xf32>
    %16 = vector.broadcast %15 : vector<8x1xf32> to vector<8x8xf32>
    %17 = arith.subf %13, %16 : vector<8x8xf32>
    %18 = math.exp %17 : vector<8x8xf32>
    %cst_7 = arith.constant dense<0.000000e+00> : vector<8xf32>
    %19 = vector.multi_reduction <add>, %18, %cst_7 [1] : vector<8x8xf32> to vector<8xf32>
    %20 = vector.shape_cast %19 : vector<8xf32> to vector<8x1xf32>
    %21 = tpu.reciprocal %20 {approx = true} : vector<8x1xf32> -> vector<8x1xf32>
    %22 = vector.broadcast %21 : vector<8x1xf32> to vector<8x8xf32>
    %23 = arith.mulf %18, %22 : vector<8x8xf32>
    %24 = arith.truncf %23 : vector<8x8xf32> to vector<8x8xbf16>
    %cst_8 = arith.constant dense<0.000000e+00> : vector<8x8xf32>
    %25 = tpu.matmul %24, %9, %cst_8 {dimension_numbers = #tpu.dot_dimension_numbers<[1], [0], [0], [1], [0, 0, 1, 1], [], []>} : vector<8x8xbf16>, vector<8x8xbf16>, vector<8x8xf32> -> vector<8x8xf32>
    %26 = vector.extract_strided_slice %1 {offsets = [0, 8], sizes = [8, 8], strides = [1, 1]} : vector<8x32xf32> to vector<8x8xf32>
    %27 = arith.truncf %26 : vector<8x8xf32> to vector<8x8xbf16>
    %28 = vector.extract_strided_slice %3 {offsets = [0, 8], sizes = [8, 8], strides = [1, 1]} : vector<8x64xf32> to vector<8x8xf32>
    %29 = arith.truncf %28 : vector<8x8xf32> to vector<8x8xbf16>
    %30 = vector.extract_strided_slice %3 {offsets = [0, 40], sizes = [8, 8], strides = [1, 1]} : vector<8x64xf32> to vector<8x8xf32>
    %31 = arith.truncf %30 : vector<8x8xf32> to vector<8x8xbf16>
    %32 = tpu.transpose %29, [1, 0] : vector<8x8xbf16> -> vector<8x8xbf16>
    %cst_9 = arith.constant dense<0.000000e+00> : vector<8x8xf32>
    %33 = tpu.matmul %27, %32, %cst_9 {dimension_numbers = #tpu.dot_dimension_numbers<[1], [0], [0], [1], [0, 0, 1, 1], [], []>} : vector<8x8xbf16>, vector<8x8xbf16>, vector<8x8xf32> -> vector<8x8xf32>
    %cst_10 = arith.constant 0.353553385 : f32
    %34 = vector.broadcast %cst_10 : f32 to vector<8x8xf32>
    %35 = arith.mulf %33, %34 : vector<8x8xf32>
    %cst_11 = arith.constant dense<0xFF800000> : vector<8xf32>
    %36 = vector.multi_reduction <maximumf>, %35, %cst_11 [1] : vector<8x8xf32> to vector<8xf32>
    %37 = vector.shape_cast %36 : vector<8xf32> to vector<8x1xf32>
    %38 = vector.broadcast %37 : vector<8x1xf32> to vector<8x8xf32>
    %39 = arith.subf %35, %38 : vector<8x8xf32>
    %40 = math.exp %39 : vector<8x8xf32>
    %cst_12 = arith.constant dense<0.000000e+00> : vector<8xf32>
    %41 = vector.multi_reduction <add>, %40, %cst_12 [1] : vector<8x8xf32> to vector<8xf32>
    %42 = vector.shape_cast %41 : vector<8xf32> to vector<8x1xf32>
    %43 = tpu.reciprocal %42 {approx = true} : vector<8x1xf32> -> vector<8x1xf32>
    %44 = vector.broadcast %43 : vector<8x1xf32> to vector<8x8xf32>
    %45 = arith.mulf %40, %44 : vector<8x8xf32>
    %46 = arith.truncf %45 : vector<8x8xf32> to vector<8x8xbf16>
    %cst_13 = arith.constant dense<0.000000e+00> : vector<8x8xf32>
    %47 = tpu.matmul %46, %31, %cst_13 {dimension_numbers = #tpu.dot_dimension_numbers<[1], [0], [0], [1], [0, 0, 1, 1], [], []>} : vector<8x8xbf16>, vector<8x8xbf16>, vector<8x8xf32> -> vector<8x8xf32>
    %48 = vector.extract_strided_slice %1 {offsets = [0, 16], sizes = [8, 8], strides = [1, 1]} : vector<8x32xf32> to vector<8x8xf32>
    %49 = arith.truncf %48 : vector<8x8xf32> to vector<8x8xbf16>
    %50 = vector.extract_strided_slice %3 {offsets = [0, 16], sizes = [8, 8], strides = [1, 1]} : vector<8x64xf32> to vector<8x8xf32>
    %51 = arith.truncf %50 : vector<8x8xf32> to vector<8x8xbf16>
    %52 = vector.extract_strided_slice %3 {offsets = [0, 48], sizes = [8, 8], strides = [1, 1]} : vector<8x64xf32> to vector<8x8xf32>
    %53 = arith.truncf %52 : vector<8x8xf32> to vector<8x8xbf16>
    %54 = tpu.transpose %51, [1, 0] : vector<8x8xbf16> -> vector<8x8xbf16>
    %cst_14 = arith.constant dense<0.000000e+00> : vector<8x8xf32>
    %55 = tpu.matmul %49, %54, %cst_14 {dimension_numbers = #tpu.dot_dimension_numbers<[1], [0], [0], [1], [0, 0, 1, 1], [], []>} : vector<8x8xbf16>, vector<8x8xbf16>, vector<8x8xf32> -> vector<8x8xf32>
    %cst_15 = arith.constant 0.353553385 : f32
    %56 = vector.broadcast %cst_15 : f32 to vector<8x8xf32>
    %57 = arith.mulf %55, %56 : vector<8x8xf32>
    %cst_16 = arith.constant dense<0xFF800000> : vector<8xf32>
    %58 = vector.multi_reduction <maximumf>, %57, %cst_16 [1] : vector<8x8xf32> to vector<8xf32>
    %59 = vector.shape_cast %58 : vector<8xf32> to vector<8x1xf32>
    %60 = vector.broadcast %59 : vector<8x1xf32> to vector<8x8xf32>
    %61 = arith.subf %57, %60 : vector<8x8xf32>
    %62 = math.exp %61 : vector<8x8xf32>
    %cst_17 = arith.constant dense<0.000000e+00> : vector<8xf32>
    %63 = vector.multi_reduction <add>, %62, %cst_17 [1] : vector<8x8xf32> to vector<8xf32>
    %64 = vector.shape_cast %63 : vector<8xf32> to vector<8x1xf32>
    %65 = tpu.reciprocal %64 {approx = true} : vector<8x1xf32> -> vector<8x1xf32>
    %66 = vector.broadcast %65 : vector<8x1xf32> to vector<8x8xf32>
    %67 = arith.mulf %62, %66 : vector<8x8xf32>
    %68 = arith.truncf %67 : vector<8x8xf32> to vector<8x8xbf16>
    %cst_18 = arith.constant dense<0.000000e+00> : vector<8x8xf32>
    %69 = tpu.matmul %68, %53, %cst_18 {dimension_numbers = #tpu.dot_dimension_numbers<[1], [0], [0], [1], [0, 0, 1, 1], [], []>} : vector<8x8xbf16>, vector<8x8xbf16>, vector<8x8xf32> -> vector<8x8xf32>
    %70 = vector.extract_strided_slice %1 {offsets = [0, 24], sizes = [8, 8], strides = [1, 1]} : vector<8x32xf32> to vector<8x8xf32>
    %71 = arith.truncf %70 : vector<8x8xf32> to vector<8x8xbf16>
    %72 = vector.extract_strided_slice %3 {offsets = [0, 24], sizes = [8, 8], strides = [1, 1]} : vector<8x64xf32> to vector<8x8xf32>
    %73 = arith.truncf %72 : vector<8x8xf32> to vector<8x8xbf16>
    %74 = vector.extract_strided_slice %3 {offsets = [0, 56], sizes = [8, 8], strides = [1, 1]} : vector<8x64xf32> to vector<8x8xf32>
    %75 = arith.truncf %74 : vector<8x8xf32> to vector<8x8xbf16>
    %76 = tpu.transpose %73, [1, 0] : vector<8x8xbf16> -> vector<8x8xbf16>
    %cst_19 = arith.constant dense<0.000000e+00> : vector<8x8xf32>
    %77 = tpu.matmul %71, %76, %cst_19 {dimension_numbers = #tpu.dot_dimension_numbers<[1], [0], [0], [1], [0, 0, 1, 1], [], []>} : vector<8x8xbf16>, vector<8x8xbf16>, vector<8x8xf32> -> vector<8x8xf32>
    %cst_20 = arith.constant 0.353553385 : f32
    %78 = vector.broadcast %cst_20 : f32 to vector<8x8xf32>
    %79 = arith.mulf %77, %78 : vector<8x8xf32>
    %cst_21 = arith.constant dense<0xFF800000> : vector<8xf32>
    %80 = vector.multi_reduction <maximumf>, %79, %cst_21 [1] : vector<8x8xf32> to vector<8xf32>
    %81 = vector.shape_cast %80 : vector<8xf32> to vector<8x1xf32>
    %82 = vector.broadcast %81 : vector<8x1xf32> to vector<8x8xf32>
    %83 = arith.subf %79, %82 : vector<8x8xf32>
    %84 = math.exp %83 : vector<8x8xf32>
    %cst_22 = arith.constant dense<0.000000e+00> : vector<8xf32>
    %85 = vector.multi_reduction <add>, %84, %cst_22 [1] : vector<8x8xf32> to vector<8xf32>
    %86 = vector.shape_cast %85 : vector<8xf32> to vector<8x1xf32>
    %87 = tpu.reciprocal %86 {approx = true} : vector<8x1xf32> -> vector<8x1xf32>
    %88 = vector.broadcast %87 : vector<8x1xf32> to vector<8x8xf32>
    %89 = arith.mulf %84, %88 : vector<8x8xf32>
    %90 = arith.truncf %89 : vector<8x8xf32> to vector<8x8xbf16>
    %cst_23 = arith.constant dense<0.000000e+00> : vector<8x8xf32>
    %91 = tpu.matmul %90, %75, %cst_23 {dimension_numbers = #tpu.dot_dimension_numbers<[1], [0], [0], [1], [0, 0, 1, 1], [], []>} : vector<8x8xbf16>, vector<8x8xbf16>, vector<8x8xf32> -> vector<8x8xf32>
    %92 = tpu.concatenate %25, %47, %69, %91 in 1 : vector<8x8xf32>, vector<8x8xf32>, vector<8x8xf32>, vector<8x8xf32> -> vector<8x32xf32>
    %c0_24 = arith.constant 0 : index
    %c0_25 = arith.constant 0 : index
    %c0_26 = arith.constant 0 : index
    %93 = vector.load %arg3[%c0_24, %c0_25, %c0_26] : memref<1x8x32xf32, #tpu.memory_space<vmem>>, vector<1x8x32xf32>
    %94 = vector.shape_cast %93 : vector<1x8x32xf32> to vector<8x32xf32>
    %95 = vector.shape_cast %92 : vector<8x32xf32> to vector<1x8x32xf32>
    tpu.vector_store %arg3[%c0_24, %c0_25, %c0_26], %95 {strides = array<i32>} : memref<1x8x32xf32, #tpu.memory_space<vmem>>, vector<1x8x32xf32>,
    return
  }
  func.func @transform_0(%arg0: i32) -> (i32, i32, i32) {
    %c0_i32 = arith.constant 0 : i32
    %c0_i32_0 = arith.constant 0 : i32
    %c0_i32_1 = arith.constant 0 : i32
    return %arg0, %c0_i32, %c0_i32_0 : i32, i32, i32
  }
  func.func @transform_1(%arg0: i32) -> (i32, i32, i32) {
    %c0_i32 = arith.constant 0 : i32
    %c0_i32_0 = arith.constant 0 : i32
    %c0_i32_1 = arith.constant 0 : i32
    return %arg0, %c0_i32, %c0_i32_0 : i32, i32, i32
  }
  func.func @transform_2(%arg0: i32) -> (i32, i32, i32) {
    %c0_i32 = arith.constant 0 : i32
    %c0_i32_0 = arith.constant 0 : i32
    %c0_i32_1 = arith.constant 0 : i32
    return %arg0, %c0_i32, %c0_i32_0 : i32, i32, i32
  }
}

module attributes {stable_mosaic.version = 11 : i64} {
  func.func @_matmul_kernel(%arg0: i32, %arg1: i32, %arg2: i32, %arg3: memref<16x32xf32, #tpu.memory_space<vmem>>, %arg4: memref<32x64xf32, #tpu.memory_space<vmem>>, %arg5: memref<1x64xf32, #tpu.memory_space<vmem>>, %arg6: memref<16x64xf32, #tpu.memory_space<vmem>>, %arg7: memref<16x64xf32, #tpu.memory_space<vmem>>) attributes {dimension_semantics = [#tpu.dimension_semantics<parallel>, #tpu.dimension_semantics<parallel>, #tpu.dimension_semantics<arbitrary>], iteration_bounds = array<i64: 1, 1, 1>, scalar_prefetch = 0 : i64, scratch_operands = 1 : i64, tpu.core_type = #tpu.core_type<tc>, window_params = [{transform_indices = @transform_0, window_bounds = array<i64: 16, 32>}, {transform_indices = @transform_1, window_bounds = array<i64: 32, 64>}, {transform_indices = @transform_2, window_bounds = array<i64: 1, 64>}, {transform_indices = @transform_3, window_bounds = array<i64: 16, 64>}]} {
    %c0_i32 = arith.constant 0 : i32
    %0 = arith.cmpi eq, %arg2, %c0_i32 : i32
    %1 = arith.extui %0 : i1 to i32
    %c0_i32_0 = arith.constant 0 : i32
    %2 = arith.cmpi ne, %1, %c0_i32_0 : i32
    scf.if %2 {
      %cst_10 = arith.constant 0.000000e+00 : f32
      %14 = vector.broadcast %cst_10 : f32 to vector<16x64xf32>
      %c0_11 = arith.constant 0 : index
      %c0_12 = arith.constant 0 : index
      %15 = vector.load %arg7[%c0_11, %c0_12] : memref<16x64xf32, #tpu.memory_space<vmem>>, vector<16x64xf32>
      tpu.vector_store %arg7[%c0_11, %c0_12], %14 {strides = array<i32>} : memref<16x64xf32, #tpu.memory_space<vmem>>, vector<16x64xf32>,
    } else {
    }
    %c0 = arith.constant 0 : index
    %c0_1 = arith.constant 0 : index
    %3 = vector.load %arg7[%c0, %c0_1] : memref<16x64xf32, #tpu.memory_space<vmem>>, vector<16x64xf32>
    %c0_2 = arith.constant 0 : index
    %c0_3 = arith.constant 0 : index
    %4 = vector.load %arg3[%c0_2, %c0_3] : memref<16x32xf32, #tpu.memory_space<vmem>>, vector<16x32xf32>
    %5 = arith.truncf %4 : vector<16x32xf32> to vector<16x32xbf16>
    %c0_4 = arith.constant 0 : index
    %c0_5 = arith.constant 0 : index
    %6 = vector.load %arg4[%c0_4, %c0_5] : memref<32x64xf32, #tpu.memory_space<vmem>>, vector<32x64xf32>
    %7 = arith.truncf %6 : vector<32x64xf32> to vector<32x64xbf16>
    %cst = arith.constant dense<0.000000e+00> : vector<16x64xf32>
    %8 = tpu.matmul %5, %7, %cst {dimension_numbers = #tpu.dot_dimension_numbers<[1], [0], [0], [1], [0, 0, 1, 1], [], []>} : vector<16x32xbf16>, vector<32x64xbf16>, vector<16x64xf32> -> vector<16x64xf32>
    %9 = arith.addf %3, %8 : vector<16x64xf32>
    %c0_6 = arith.constant 0 : index
    %c0_7 = arith.constant 0 : index
    %10 = vector.load %arg7[%c0_6, %c0_7] : memref<16x64xf32, #tpu.memory_space<vmem>>, vector<16x64xf32>
    tpu.vector_store %arg7[%c0_6, %c0_7], %9 {strides = array<i32>} : memref<16x64xf32, #tpu.memory_space<vmem>>, vector<16x64xf32>,
    %c0_i32_8 = arith.constant 0 : i32
    %11 = arith.cmpi eq, %arg2, %c0_i32_8 : i32
    %12 = arith.extui %11 : i1 to i32
    %c0_i32_9 = arith.constant 0 : i32
    %13 = arith.cmpi ne, %12, %c0_i32_9 : i32
    scf.if %13 {
      %c0_10 = arith.constant 0 : index
      %c0_11 = arith.constant 0 : index
      %14 = vector.load %arg7[%c0_10, %c0_11] : memref<16x64xf32, #tpu.memory_space<vmem>>, vector<16x64xf32>
      %c0_12 = arith.constant 0 : index
      %c0_13 = arith.constant 0 : index
      %15 = vector.load %arg5[%c0_12, %c0_13] : memref<1x64xf32, #tpu.memory_space<vmem>>, vector<1x64xf32>
      %16 = vector.broadcast %15 : vector<1x64xf32> to vector<16x64xf32>
      %17 = arith.addf %14, %16 : vector<16x64xf32>
      %cst_14 = arith.constant 0.000000e+00 : f32
      %18 = vector.broadcast %cst_14 : f32 to vector<16x64xf32>
      %19 = arith.maximumf %17, %18 : vector<16x64xf32>
      %c0_15 = arith.constant 0 : index
      %c0_16 = arith.constant 0 : index
      %20 = vector.load %arg6[%c0_15, %c0_16] : memref<16x64xf32, #tpu.memory_space<vmem>>, vector<16x64xf32>
      tpu.vector_store %arg6[%c0_15, %c0_16], %19 {strides = array<i32>} : memref<16x64xf32, #tpu.memory_space<vmem>>, vector<16x64xf32>,
    } else {
    }
    return
  }
  func.func @transform_0(%arg0: i32, %arg1: i32, %arg2: i32) -> (i32, i32) {
    %c0_i32 = arith.constant 0 : i32
    return %arg0, %arg2 : i32, i32
  }
  func.func @transform_1(%arg0: i32, %arg1: i32, %arg2: i32) -> (i32, i32) {
    %c0_i32 = arith.constant 0 : i32
    return %arg2, %arg1 : i32, i32
  }
  func.func @transform_2(%arg0: i32, %arg1: i32, %arg2: i32) -> (i32, i32) {
    %c0_i32 = arith.constant 0 : i32
    %c0_i32_0 = arith.constant 0 : i32
    return %c0_i32, %arg1 : i32, i32
  }
  func.func @transform_3(%arg0: i32, %arg1: i32, %arg2: i32) -> (i32, i32) {
    %c0_i32 = arith.constant 0 : i32
    return %arg0, %arg1 : i32, i32
  }
}

module attributes {stable_mosaic.version = 11 : i64} {
  func.func @_matmul_res_ln_kernel(%arg0: i32, %arg1: i32, %arg2: memref<16x32xf32, #tpu.memory_space<vmem>>, %arg3: memref<32x32xf32, #tpu.memory_space<vmem>>, %arg4: memref<1x32xf32, #tpu.memory_space<vmem>>, %arg5: memref<16x32xf32, #tpu.memory_space<vmem>>, %arg6: memref<1x32xf32, #tpu.memory_space<vmem>>, %arg7: memref<1x32xf32, #tpu.memory_space<vmem>>, %arg8: memref<16x32xf32, #tpu.memory_space<vmem>>, %arg9: memref<16x32xf32, #tpu.memory_space<vmem>>) attributes {dimension_semantics = [#tpu.dimension_semantics<parallel>, #tpu.dimension_semantics<arbitrary>], iteration_bounds = array<i64: 1, 1>, scalar_prefetch = 0 : i64, scratch_operands = 1 : i64, tpu.core_type = #tpu.core_type<tc>, window_params = [{transform_indices = @transform_0, window_bounds = array<i64: 16, 32>}, {transform_indices = @transform_1, window_bounds = array<i64: 32, 32>}, {pipeline_mode = #tpu.pipeline_mode<synchronous>, transform_indices = @transform_2, window_bounds = array<i64: 1, 32>}, {transform_indices = @transform_3, window_bounds = array<i64: 16, 32>}, {pipeline_mode = #tpu.pipeline_mode<synchronous>, transform_indices = @transform_4, window_bounds = array<i64: 1, 32>}, {pipeline_mode = #tpu.pipeline_mode<synchronous>, transform_indices = @transform_5, window_bounds = array<i64: 1, 32>}, {transform_indices = @transform_6, window_bounds = array<i64: 16, 32>}]} {
    %c0_i32 = arith.constant 0 : i32
    %0 = arith.cmpi eq, %arg1, %c0_i32 : i32
    %1 = arith.extui %0 : i1 to i32
    %c0_i32_0 = arith.constant 0 : i32
    %2 = arith.cmpi ne, %1, %c0_i32_0 : i32
    scf.if %2 {
      %cst_10 = arith.constant 0.000000e+00 : f32
      %14 = vector.broadcast %cst_10 : f32 to vector<16x32xf32>
      %c0_11 = arith.constant 0 : index
      %c0_12 = arith.constant 0 : index
      %15 = vector.load %arg9[%c0_11, %c0_12] : memref<16x32xf32, #tpu.memory_space<vmem>>, vector<16x32xf32>
      tpu.vector_store %arg9[%c0_11, %c0_12], %14 {strides = array<i32>} : memref<16x32xf32, #tpu.memory_space<vmem>>, vector<16x32xf32>,
    } else {
    }
    %c0 = arith.constant 0 : index
    %c0_1 = arith.constant 0 : index
    %3 = vector.load %arg9[%c0, %c0_1] : memref<16x32xf32, #tpu.memory_space<vmem>>, vector<16x32xf32>
    %c0_2 = arith.constant 0 : index
    %c0_3 = arith.constant 0 : index
    %4 = vector.load %arg2[%c0_2, %c0_3] : memref<16x32xf32, #tpu.memory_space<vmem>>, vector<16x32xf32>
    %5 = arith.truncf %4 : vector<16x32xf32> to vector<16x32xbf16>
    %c0_4 = arith.constant 0 : index
    %c0_5 = arith.constant 0 : index
    %6 = vector.load %arg3[%c0_4, %c0_5] : memref<32x32xf32, #tpu.memory_space<vmem>>, vector<32x32xf32>
    %7 = arith.truncf %6 : vector<32x32xf32> to vector<32x32xbf16>
    %cst = arith.constant dense<0.000000e+00> : vector<16x32xf32>
    %8 = tpu.matmul %5, %7, %cst {dimension_numbers = #tpu.dot_dimension_numbers<[1], [0], [0], [1], [0, 0, 1, 1], [], []>} : vector<16x32xbf16>, vector<32x32xbf16>, vector<16x32xf32> -> vector<16x32xf32>
    %9 = arith.addf %3, %8 : vector<16x32xf32>
    %c0_6 = arith.constant 0 : index
    %c0_7 = arith.constant 0 : index
    %10 = vector.load %arg9[%c0_6, %c0_7] : memref<16x32xf32, #tpu.memory_space<vmem>>, vector<16x32xf32>
    tpu.vector_store %arg9[%c0_6, %c0_7], %9 {strides = array<i32>} : memref<16x32xf32, #tpu.memory_space<vmem>>, vector<16x32xf32>,
    %c0_i32_8 = arith.constant 0 : i32
    %11 = arith.cmpi eq, %arg1, %c0_i32_8 : i32
    %12 = arith.extui %11 : i1 to i32
    %c0_i32_9 = arith.constant 0 : i32
    %13 = arith.cmpi ne, %12, %c0_i32_9 : i32
    scf.if %13 {
      %c0_10 = arith.constant 0 : index
      %c0_11 = arith.constant 0 : index
      %14 = vector.load %arg9[%c0_10, %c0_11] : memref<16x32xf32, #tpu.memory_space<vmem>>, vector<16x32xf32>
      %c0_12 = arith.constant 0 : index
      %c0_13 = arith.constant 0 : index
      %15 = vector.load %arg4[%c0_12, %c0_13] : memref<1x32xf32, #tpu.memory_space<vmem>>, vector<1x32xf32>
      %16 = vector.broadcast %15 : vector<1x32xf32> to vector<16x32xf32>
      %17 = arith.addf %14, %16 : vector<16x32xf32>
      %c0_14 = arith.constant 0 : index
      %c0_15 = arith.constant 0 : index
      %18 = vector.load %arg5[%c0_14, %c0_15] : memref<16x32xf32, #tpu.memory_space<vmem>>, vector<16x32xf32>
      %19 = arith.addf %17, %18 : vector<16x32xf32>
      %cst_16 = arith.constant dense<0.000000e+00> : vector<16xf32>
      %20 = vector.multi_reduction <add>, %19, %cst_16 [1] : vector<16x32xf32> to vector<16xf32>
      %21 = vector.shape_cast %20 : vector<16xf32> to vector<16x1xf32>
      %cst_17 = arith.constant 3.200000e+01 : f32
      %22 = vector.broadcast %cst_17 : f32 to vector<16x1xf32>
      %23 = arith.divf %21, %22 : vector<16x1xf32>
      %24 = vector.broadcast %23 : vector<16x1xf32> to vector<16x32xf32>
      %25 = arith.subf %19, %24 : vector<16x32xf32>
      %26 = arith.mulf %25, %25 : vector<16x32xf32>
      %cst_18 = arith.constant dense<0.000000e+00> : vector<16xf32>
      %27 = vector.multi_reduction <add>, %26, %cst_18 [1] : vector<16x32xf32> to vector<16xf32>
      %28 = vector.shape_cast %27 : vector<16xf32> to vector<16x1xf32>
      %cst_19 = arith.constant 3.200000e+01 : f32
      %29 = vector.broadcast %cst_19 : f32 to vector<16x1xf32>
      %30 = arith.divf %28, %29 : vector<16x1xf32>
      %31 = vector.broadcast %23 : vector<16x1xf32> to vector<16x32xf32>
      %32 = arith.subf %19, %31 : vector<16x32xf32>
      %cst_20 = arith.constant 9.99999974E-6 : f32
      %33 = vector.broadcast %cst_20 : f32 to vector<16x1xf32>
      %34 = arith.addf %30, %33 : vector<16x1xf32>
      %35 = math.rsqrt %34 : vector<16x1xf32>
      %36 = vector.broadcast %35 : vector<16x1xf32> to vector<16x32xf32>
      %37 = arith.mulf %32, %36 : vector<16x32xf32>
      %c0_21 = arith.constant 0 : index
      %c0_22 = arith.constant 0 : index
      %38 = vector.load %arg6[%c0_21, %c0_22] : memref<1x32xf32, #tpu.memory_space<vmem>>, vector<1x32xf32>
      %39 = vector.broadcast %38 : vector<1x32xf32> to vector<16x32xf32>
      %40 = arith.mulf %37, %39 : vector<16x32xf32>
      %c0_23 = arith.constant 0 : index
      %c0_24 = arith.constant 0 : index
      %41 = vector.load %arg7[%c0_23, %c0_24] : memref<1x32xf32, #tpu.memory_space<vmem>>, vector<1x32xf32>
      %42 = vector.broadcast %41 : vector<1x32xf32> to vector<16x32xf32>
      %43 = arith.addf %40, %42 : vector<16x32xf32>
      %c0_25 = arith.constant 0 : index
      %c0_26 = arith.constant 0 : index
      %44 = vector.load %arg8[%c0_25, %c0_26] : memref<16x32xf32, #tpu.memory_space<vmem>>, vector<16x32xf32>
      tpu.vector_store %arg8[%c0_25, %c0_26], %43 {strides = array<i32>} : memref<16x32xf32, #tpu.memory_space<vmem>>, vector<16x32xf32>,
    } else {
    }
    return
  }
  func.func @transform_0(%arg0: i32, %arg1: i32) -> (i32, i32) {
    %c0_i32 = arith.constant 0 : i32
    return %arg0, %arg1 : i32, i32
  }
  func.func @transform_1(%arg0: i32, %arg1: i32) -> (i32, i32) {
    %c0_i32 = arith.constant 0 : i32
    %c0_i32_0 = arith.constant 0 : i32
    return %arg1, %c0_i32 : i32, i32
  }
  func.func @transform_2(%arg0: i32, %arg1: i32) -> (i32, i32) {
    %c0_i32 = arith.constant 0 : i32
    %c0_i32_0 = arith.constant 0 : i32
    %c0_i32_1 = arith.constant 0 : i32
    return %c0_i32, %c0_i32_0 : i32, i32
  }
  func.func @transform_3(%arg0: i32, %arg1: i32) -> (i32, i32) {
    %c0_i32 = arith.constant 0 : i32
    %c0_i32_0 = arith.constant 0 : i32
    return %arg0, %c0_i32 : i32, i32
  }
  func.func @transform_4(%arg0: i32, %arg1: i32) -> (i32, i32) {
    %c0_i32 = arith.constant 0 : i32
    %c0_i32_0 = arith.constant 0 : i32
    %c0_i32_1 = arith.constant 0 : i32
    return %c0_i32, %c0_i32_0 : i32, i32
  }
  func.func @transform_5(%arg0: i32, %arg1: i32) -> (i32, i32) {
    %c0_i32 = arith.constant 0 : i32
    %c0_i32_0 = arith.constant 0 : i32
    %c0_i32_1 = arith.constant 0 : i32
    return %c0_i32, %c0_i32_0 : i32, i32
  }
  func.func @transform_6(%arg0: i32, %arg1: i32) -> (i32, i32) {
    %c0_i32 = arith.constant 0 : i32
    %c0_i32_0 = arith.constant 0 : i32
    return %arg0, %c0_i32 : i32, i32
  }
}

module attributes {stable_mosaic.version = 11 : i64} {
  func.func @_matmul_res_ln_kernel(%arg0: i32, %arg1: i32, %arg2: memref<16x64xf32, #tpu.memory_space<vmem>>, %arg3: memref<64x32xf32, #tpu.memory_space<vmem>>, %arg4: memref<1x32xf32, #tpu.memory_space<vmem>>, %arg5: memref<16x32xf32, #tpu.memory_space<vmem>>, %arg6: memref<1x32xf32, #tpu.memory_space<vmem>>, %arg7: memref<1x32xf32, #tpu.memory_space<vmem>>, %arg8: memref<16x32xf32, #tpu.memory_space<vmem>>, %arg9: memref<16x32xf32, #tpu.memory_space<vmem>>) attributes {dimension_semantics = [#tpu.dimension_semantics<parallel>, #tpu.dimension_semantics<arbitrary>], iteration_bounds = array<i64: 1, 1>, scalar_prefetch = 0 : i64, scratch_operands = 1 : i64, tpu.core_type = #tpu.core_type<tc>, window_params = [{transform_indices = @transform_0, window_bounds = array<i64: 16, 64>}, {transform_indices = @transform_1, window_bounds = array<i64: 64, 32>}, {pipeline_mode = #tpu.pipeline_mode<synchronous>, transform_indices = @transform_2, window_bounds = array<i64: 1, 32>}, {transform_indices = @transform_3, window_bounds = array<i64: 16, 32>}, {pipeline_mode = #tpu.pipeline_mode<synchronous>, transform_indices = @transform_4, window_bounds = array<i64: 1, 32>}, {pipeline_mode = #tpu.pipeline_mode<synchronous>, transform_indices = @transform_5, window_bounds = array<i64: 1, 32>}, {transform_indices = @transform_6, window_bounds = array<i64: 16, 32>}]} {
    %c0_i32 = arith.constant 0 : i32
    %0 = arith.cmpi eq, %arg1, %c0_i32 : i32
    %1 = arith.extui %0 : i1 to i32
    %c0_i32_0 = arith.constant 0 : i32
    %2 = arith.cmpi ne, %1, %c0_i32_0 : i32
    scf.if %2 {
      %cst_10 = arith.constant 0.000000e+00 : f32
      %14 = vector.broadcast %cst_10 : f32 to vector<16x32xf32>
      %c0_11 = arith.constant 0 : index
      %c0_12 = arith.constant 0 : index
      %15 = vector.load %arg9[%c0_11, %c0_12] : memref<16x32xf32, #tpu.memory_space<vmem>>, vector<16x32xf32>
      tpu.vector_store %arg9[%c0_11, %c0_12], %14 {strides = array<i32>} : memref<16x32xf32, #tpu.memory_space<vmem>>, vector<16x32xf32>,
    } else {
    }
    %c0 = arith.constant 0 : index
    %c0_1 = arith.constant 0 : index
    %3 = vector.load %arg9[%c0, %c0_1] : memref<16x32xf32, #tpu.memory_space<vmem>>, vector<16x32xf32>
    %c0_2 = arith.constant 0 : index
    %c0_3 = arith.constant 0 : index
    %4 = vector.load %arg2[%c0_2, %c0_3] : memref<16x64xf32, #tpu.memory_space<vmem>>, vector<16x64xf32>
    %5 = arith.truncf %4 : vector<16x64xf32> to vector<16x64xbf16>
    %c0_4 = arith.constant 0 : index
    %c0_5 = arith.constant 0 : index
    %6 = vector.load %arg3[%c0_4, %c0_5] : memref<64x32xf32, #tpu.memory_space<vmem>>, vector<64x32xf32>
    %7 = arith.truncf %6 : vector<64x32xf32> to vector<64x32xbf16>
    %cst = arith.constant dense<0.000000e+00> : vector<16x32xf32>
    %8 = tpu.matmul %5, %7, %cst {dimension_numbers = #tpu.dot_dimension_numbers<[1], [0], [0], [1], [0, 0, 1, 1], [], []>} : vector<16x64xbf16>, vector<64x32xbf16>, vector<16x32xf32> -> vector<16x32xf32>
    %9 = arith.addf %3, %8 : vector<16x32xf32>
    %c0_6 = arith.constant 0 : index
    %c0_7 = arith.constant 0 : index
    %10 = vector.load %arg9[%c0_6, %c0_7] : memref<16x32xf32, #tpu.memory_space<vmem>>, vector<16x32xf32>
    tpu.vector_store %arg9[%c0_6, %c0_7], %9 {strides = array<i32>} : memref<16x32xf32, #tpu.memory_space<vmem>>, vector<16x32xf32>,
    %c0_i32_8 = arith.constant 0 : i32
    %11 = arith.cmpi eq, %arg1, %c0_i32_8 : i32
    %12 = arith.extui %11 : i1 to i32
    %c0_i32_9 = arith.constant 0 : i32
    %13 = arith.cmpi ne, %12, %c0_i32_9 : i32
    scf.if %13 {
      %c0_10 = arith.constant 0 : index
      %c0_11 = arith.constant 0 : index
      %14 = vector.load %arg9[%c0_10, %c0_11] : memref<16x32xf32, #tpu.memory_space<vmem>>, vector<16x32xf32>
      %c0_12 = arith.constant 0 : index
      %c0_13 = arith.constant 0 : index
      %15 = vector.load %arg4[%c0_12, %c0_13] : memref<1x32xf32, #tpu.memory_space<vmem>>, vector<1x32xf32>
      %16 = vector.broadcast %15 : vector<1x32xf32> to vector<16x32xf32>
      %17 = arith.addf %14, %16 : vector<16x32xf32>
      %c0_14 = arith.constant 0 : index
      %c0_15 = arith.constant 0 : index
      %18 = vector.load %arg5[%c0_14, %c0_15] : memref<16x32xf32, #tpu.memory_space<vmem>>, vector<16x32xf32>
      %19 = arith.addf %17, %18 : vector<16x32xf32>
      %cst_16 = arith.constant dense<0.000000e+00> : vector<16xf32>
      %20 = vector.multi_reduction <add>, %19, %cst_16 [1] : vector<16x32xf32> to vector<16xf32>
      %21 = vector.shape_cast %20 : vector<16xf32> to vector<16x1xf32>
      %cst_17 = arith.constant 3.200000e+01 : f32
      %22 = vector.broadcast %cst_17 : f32 to vector<16x1xf32>
      %23 = arith.divf %21, %22 : vector<16x1xf32>
      %24 = vector.broadcast %23 : vector<16x1xf32> to vector<16x32xf32>
      %25 = arith.subf %19, %24 : vector<16x32xf32>
      %26 = arith.mulf %25, %25 : vector<16x32xf32>
      %cst_18 = arith.constant dense<0.000000e+00> : vector<16xf32>
      %27 = vector.multi_reduction <add>, %26, %cst_18 [1] : vector<16x32xf32> to vector<16xf32>
      %28 = vector.shape_cast %27 : vector<16xf32> to vector<16x1xf32>
      %cst_19 = arith.constant 3.200000e+01 : f32
      %29 = vector.broadcast %cst_19 : f32 to vector<16x1xf32>
      %30 = arith.divf %28, %29 : vector<16x1xf32>
      %31 = vector.broadcast %23 : vector<16x1xf32> to vector<16x32xf32>
      %32 = arith.subf %19, %31 : vector<16x32xf32>
      %cst_20 = arith.constant 9.99999974E-6 : f32
      %33 = vector.broadcast %cst_20 : f32 to vector<16x1xf32>
      %34 = arith.addf %30, %33 : vector<16x1xf32>
      %35 = math.rsqrt %34 : vector<16x1xf32>
      %36 = vector.broadcast %35 : vector<16x1xf32> to vector<16x32xf32>
      %37 = arith.mulf %32, %36 : vector<16x32xf32>
      %c0_21 = arith.constant 0 : index
      %c0_22 = arith.constant 0 : index
      %38 = vector.load %arg6[%c0_21, %c0_22] : memref<1x32xf32, #tpu.memory_space<vmem>>, vector<1x32xf32>
      %39 = vector.broadcast %38 : vector<1x32xf32> to vector<16x32xf32>
      %40 = arith.mulf %37, %39 : vector<16x32xf32>
      %c0_23 = arith.constant 0 : index
      %c0_24 = arith.constant 0 : index
      %41 = vector.load %arg7[%c0_23, %c0_24] : memref<1x32xf32, #tpu.memory_space<vmem>>, vector<1x32xf32>
      %42 = vector.broadcast %41 : vector<1x32xf32> to vector<16x32xf32>
      %43 = arith.addf %40, %42 : vector<16x32xf32>
      %c0_25 = arith.constant 0 : index
      %c0_26 = arith.constant 0 : index
      %44 = vector.load %arg8[%c0_25, %c0_26] : memref<16x32xf32, #tpu.memory_space<vmem>>, vector<16x32xf32>
      tpu.vector_store %arg8[%c0_25, %c0_26], %43 {strides = array<i32>} : memref<16x32xf32, #tpu.memory_space<vmem>>, vector<16x32xf32>,
    } else {
    }
    return
  }
  func.func @transform_0(%arg0: i32, %arg1: i32) -> (i32, i32) {
    %c0_i32 = arith.constant 0 : i32
    return %arg0, %arg1 : i32, i32
  }
  func.func @transform_1(%arg0: i32, %arg1: i32) -> (i32, i32) {
    %c0_i32 = arith.constant 0 : i32
    %c0_i32_0 = arith.constant 0 : i32
    return %arg1, %c0_i32 : i32, i32
  }
  func.func @transform_2(%arg0: i32, %arg1: i32) -> (i32, i32) {
    %c0_i32 = arith.constant 0 : i32
    %c0_i32_0 = arith.constant 0 : i32
    %c0_i32_1 = arith.constant 0 : i32
    return %c0_i32, %c0_i32_0 : i32, i32
  }
  func.func @transform_3(%arg0: i32, %arg1: i32) -> (i32, i32) {
    %c0_i32 = arith.constant 0 : i32
    %c0_i32_0 = arith.constant 0 : i32
    return %arg0, %c0_i32 : i32, i32
  }
  func.func @transform_4(%arg0: i32, %arg1: i32) -> (i32, i32) {
    %c0_i32 = arith.constant 0 : i32
    %c0_i32_0 = arith.constant 0 : i32
    %c0_i32_1 = arith.constant 0 : i32
    return %c0_i32, %c0_i32_0 : i32, i32
  }
  func.func @transform_5(%arg0: i32, %arg1: i32) -> (i32, i32) {
    %c0_i32 = arith.constant 0 : i32
    %c0_i32_0 = arith.constant 0 : i32
    %c0_i32_1 = arith.constant 0 : i32
    return %c0_i32, %c0_i32_0 : i32, i32
  }
  func.func @transform_6(%arg0: i32, %arg1: i32) -> (i32, i32) {
    %c0_i32 = arith.constant 0 : i32
    %c0_i32_0 = arith.constant 0 : i32
    return %arg0, %c0_i32 : i32, i32
  }
}

module attributes {stable_mosaic.version = 11 : i64} {
  func.func @_matmul_kernel(%arg0: i32, %arg1: i32, %arg2: i32, %arg3: memref<16x32xf32, #tpu.memory_space<vmem>>, %arg4: memref<32x32xf32, #tpu.memory_space<vmem>>, %arg5: memref<1x32xf32, #tpu.memory_space<vmem>>, %arg6: memref<16x32xf32, #tpu.memory_space<vmem>>, %arg7: memref<16x32xf32, #tpu.memory_space<vmem>>) attributes {dimension_semantics = [#tpu.dimension_semantics<parallel>, #tpu.dimension_semantics<parallel>, #tpu.dimension_semantics<arbitrary>], iteration_bounds = array<i64: 1, 1, 1>, scalar_prefetch = 0 : i64, scratch_operands = 1 : i64, tpu.core_type = #tpu.core_type<tc>, window_params = [{transform_indices = @transform_0, window_bounds = array<i64: 16, 32>}, {transform_indices = @transform_1, window_bounds = array<i64: 32, 32>}, {transform_indices = @transform_2, window_bounds = array<i64: 1, 32>}, {transform_indices = @transform_3, window_bounds = array<i64: 16, 32>}]} {
    %c0_i32 = arith.constant 0 : i32
    %0 = arith.cmpi eq, %arg2, %c0_i32 : i32
    %1 = arith.extui %0 : i1 to i32
    %c0_i32_0 = arith.constant 0 : i32
    %2 = arith.cmpi ne, %1, %c0_i32_0 : i32
    scf.if %2 {
      %cst_10 = arith.constant 0.000000e+00 : f32
      %14 = vector.broadcast %cst_10 : f32 to vector<16x32xf32>
      %c0_11 = arith.constant 0 : index
      %c0_12 = arith.constant 0 : index
      %15 = vector.load %arg7[%c0_11, %c0_12] : memref<16x32xf32, #tpu.memory_space<vmem>>, vector<16x32xf32>
      tpu.vector_store %arg7[%c0_11, %c0_12], %14 {strides = array<i32>} : memref<16x32xf32, #tpu.memory_space<vmem>>, vector<16x32xf32>,
    } else {
    }
    %c0 = arith.constant 0 : index
    %c0_1 = arith.constant 0 : index
    %3 = vector.load %arg7[%c0, %c0_1] : memref<16x32xf32, #tpu.memory_space<vmem>>, vector<16x32xf32>
    %c0_2 = arith.constant 0 : index
    %c0_3 = arith.constant 0 : index
    %4 = vector.load %arg3[%c0_2, %c0_3] : memref<16x32xf32, #tpu.memory_space<vmem>>, vector<16x32xf32>
    %5 = arith.truncf %4 : vector<16x32xf32> to vector<16x32xbf16>
    %c0_4 = arith.constant 0 : index
    %c0_5 = arith.constant 0 : index
    %6 = vector.load %arg4[%c0_4, %c0_5] : memref<32x32xf32, #tpu.memory_space<vmem>>, vector<32x32xf32>
    %7 = arith.truncf %6 : vector<32x32xf32> to vector<32x32xbf16>
    %cst = arith.constant dense<0.000000e+00> : vector<16x32xf32>
    %8 = tpu.matmul %5, %7, %cst {dimension_numbers = #tpu.dot_dimension_numbers<[1], [0], [0], [1], [0, 0, 1, 1], [], []>} : vector<16x32xbf16>, vector<32x32xbf16>, vector<16x32xf32> -> vector<16x32xf32>
    %9 = arith.addf %3, %8 : vector<16x32xf32>
    %c0_6 = arith.constant 0 : index
    %c0_7 = arith.constant 0 : index
    %10 = vector.load %arg7[%c0_6, %c0_7] : memref<16x32xf32, #tpu.memory_space<vmem>>, vector<16x32xf32>
    tpu.vector_store %arg7[%c0_6, %c0_7], %9 {strides = array<i32>} : memref<16x32xf32, #tpu.memory_space<vmem>>, vector<16x32xf32>,
    %c0_i32_8 = arith.constant 0 : i32
    %11 = arith.cmpi eq, %arg2, %c0_i32_8 : i32
    %12 = arith.extui %11 : i1 to i32
    %c0_i32_9 = arith.constant 0 : i32
    %13 = arith.cmpi ne, %12, %c0_i32_9 : i32
    scf.if %13 {
      %c0_10 = arith.constant 0 : index
      %c0_11 = arith.constant 0 : index
      %14 = vector.load %arg7[%c0_10, %c0_11] : memref<16x32xf32, #tpu.memory_space<vmem>>, vector<16x32xf32>
      %c0_12 = arith.constant 0 : index
      %c0_13 = arith.constant 0 : index
      %15 = vector.load %arg5[%c0_12, %c0_13] : memref<1x32xf32, #tpu.memory_space<vmem>>, vector<1x32xf32>
      %16 = vector.broadcast %15 : vector<1x32xf32> to vector<16x32xf32>
      %17 = arith.addf %14, %16 : vector<16x32xf32>
      %c0_14 = arith.constant 0 : index
      %c0_15 = arith.constant 0 : index
      %18 = vector.load %arg6[%c0_14, %c0_15] : memref<16x32xf32, #tpu.memory_space<vmem>>, vector<16x32xf32>
      tpu.vector_store %arg6[%c0_14, %c0_15], %17 {strides = array<i32>} : memref<16x32xf32, #tpu.memory_space<vmem>>, vector<16x32xf32>,
    } else {
    }
    return
  }
  func.func @transform_0(%arg0: i32, %arg1: i32, %arg2: i32) -> (i32, i32) {
    %c0_i32 = arith.constant 0 : i32
    return %arg0, %arg2 : i32, i32
  }
  func.func @transform_1(%arg0: i32, %arg1: i32, %arg2: i32) -> (i32, i32) {
    %c0_i32 = arith.constant 0 : i32
    return %arg2, %arg1 : i32, i32
  }
  func.func @transform_2(%arg0: i32, %arg1: i32, %arg2: i32) -> (i32, i32) {
    %c0_i32 = arith.constant 0 : i32
    %c0_i32_0 = arith.constant 0 : i32
    return %c0_i32, %arg1 : i32, i32
  }
  func.func @transform_3(%arg0: i32, %arg1: i32, %arg2: i32) -> (i32, i32) {
    %c0_i32 = arith.constant 0 : i32
    return %arg0, %arg1 : i32, i32
  }
}

module attributes {stable_mosaic.version = 11 : i64} {
  func.func @_matmul_res_ln_kernel(%arg0: i32, %arg1: i32, %arg2: memref<16x32xf32, #tpu.memory_space<vmem>>, %arg3: memref<32x32xf32, #tpu.memory_space<vmem>>, %arg4: memref<1x32xf32, #tpu.memory_space<vmem>>, %arg5: memref<16x32xf32, #tpu.memory_space<vmem>>, %arg6: memref<1x32xf32, #tpu.memory_space<vmem>>, %arg7: memref<1x32xf32, #tpu.memory_space<vmem>>, %arg8: memref<16x32xf32, #tpu.memory_space<vmem>>, %arg9: memref<16x32xf32, #tpu.memory_space<vmem>>) attributes {dimension_semantics = [#tpu.dimension_semantics<parallel>, #tpu.dimension_semantics<arbitrary>], iteration_bounds = array<i64: 1, 1>, scalar_prefetch = 0 : i64, scratch_operands = 1 : i64, tpu.core_type = #tpu.core_type<tc>, window_params = [{transform_indices = @transform_0, window_bounds = array<i64: 16, 32>}, {transform_indices = @transform_1, window_bounds = array<i64: 32, 32>}, {pipeline_mode = #tpu.pipeline_mode<synchronous>, transform_indices = @transform_2, window_bounds = array<i64: 1, 32>}, {transform_indices = @transform_3, window_bounds = array<i64: 16, 32>}, {pipeline_mode = #tpu.pipeline_mode<synchronous>, transform_indices = @transform_4, window_bounds = array<i64: 1, 32>}, {pipeline_mode = #tpu.pipeline_mode<synchronous>, transform_indices = @transform_5, window_bounds = array<i64: 1, 32>}, {transform_indices = @transform_6, window_bounds = array<i64: 16, 32>}]} {
    %c0_i32 = arith.constant 0 : i32
    %0 = arith.cmpi eq, %arg1, %c0_i32 : i32
    %1 = arith.extui %0 : i1 to i32
    %c0_i32_0 = arith.constant 0 : i32
    %2 = arith.cmpi ne, %1, %c0_i32_0 : i32
    scf.if %2 {
      %cst_10 = arith.constant 0.000000e+00 : f32
      %14 = vector.broadcast %cst_10 : f32 to vector<16x32xf32>
      %c0_11 = arith.constant 0 : index
      %c0_12 = arith.constant 0 : index
      %15 = vector.load %arg9[%c0_11, %c0_12] : memref<16x32xf32, #tpu.memory_space<vmem>>, vector<16x32xf32>
      tpu.vector_store %arg9[%c0_11, %c0_12], %14 {strides = array<i32>} : memref<16x32xf32, #tpu.memory_space<vmem>>, vector<16x32xf32>,
    } else {
    }
    %c0 = arith.constant 0 : index
    %c0_1 = arith.constant 0 : index
    %3 = vector.load %arg9[%c0, %c0_1] : memref<16x32xf32, #tpu.memory_space<vmem>>, vector<16x32xf32>
    %c0_2 = arith.constant 0 : index
    %c0_3 = arith.constant 0 : index
    %4 = vector.load %arg2[%c0_2, %c0_3] : memref<16x32xf32, #tpu.memory_space<vmem>>, vector<16x32xf32>
    %5 = arith.truncf %4 : vector<16x32xf32> to vector<16x32xbf16>
    %c0_4 = arith.constant 0 : index
    %c0_5 = arith.constant 0 : index
    %6 = vector.load %arg3[%c0_4, %c0_5] : memref<32x32xf32, #tpu.memory_space<vmem>>, vector<32x32xf32>
    %7 = arith.truncf %6 : vector<32x32xf32> to vector<32x32xbf16>
    %cst = arith.constant dense<0.000000e+00> : vector<16x32xf32>
    %8 = tpu.matmul %5, %7, %cst {dimension_numbers = #tpu.dot_dimension_numbers<[1], [0], [0], [1], [0, 0, 1, 1], [], []>} : vector<16x32xbf16>, vector<32x32xbf16>, vector<16x32xf32> -> vector<16x32xf32>
    %9 = arith.addf %3, %8 : vector<16x32xf32>
    %c0_6 = arith.constant 0 : index
    %c0_7 = arith.constant 0 : index
    %10 = vector.load %arg9[%c0_6, %c0_7] : memref<16x32xf32, #tpu.memory_space<vmem>>, vector<16x32xf32>
    tpu.vector_store %arg9[%c0_6, %c0_7], %9 {strides = array<i32>} : memref<16x32xf32, #tpu.memory_space<vmem>>, vector<16x32xf32>,
    %c0_i32_8 = arith.constant 0 : i32
    %11 = arith.cmpi eq, %arg1, %c0_i32_8 : i32
    %12 = arith.extui %11 : i1 to i32
    %c0_i32_9 = arith.constant 0 : i32
    %13 = arith.cmpi ne, %12, %c0_i32_9 : i32
    scf.if %13 {
      %c0_10 = arith.constant 0 : index
      %c0_11 = arith.constant 0 : index
      %14 = vector.load %arg9[%c0_10, %c0_11] : memref<16x32xf32, #tpu.memory_space<vmem>>, vector<16x32xf32>
      %c0_12 = arith.constant 0 : index
      %c0_13 = arith.constant 0 : index
      %15 = vector.load %arg4[%c0_12, %c0_13] : memref<1x32xf32, #tpu.memory_space<vmem>>, vector<1x32xf32>
      %16 = vector.broadcast %15 : vector<1x32xf32> to vector<16x32xf32>
      %17 = arith.addf %14, %16 : vector<16x32xf32>
      %c0_14 = arith.constant 0 : index
      %c0_15 = arith.constant 0 : index
      %18 = vector.load %arg5[%c0_14, %c0_15] : memref<16x32xf32, #tpu.memory_space<vmem>>, vector<16x32xf32>
      %19 = arith.addf %17, %18 : vector<16x32xf32>
      %cst_16 = arith.constant dense<0.000000e+00> : vector<16xf32>
      %20 = vector.multi_reduction <add>, %19, %cst_16 [1] : vector<16x32xf32> to vector<16xf32>
      %21 = vector.shape_cast %20 : vector<16xf32> to vector<16x1xf32>
      %cst_17 = arith.constant 3.200000e+01 : f32
      %22 = vector.broadcast %cst_17 : f32 to vector<16x1xf32>
      %23 = arith.divf %21, %22 : vector<16x1xf32>
      %24 = vector.broadcast %23 : vector<16x1xf32> to vector<16x32xf32>
      %25 = arith.subf %19, %24 : vector<16x32xf32>
      %26 = arith.mulf %25, %25 : vector<16x32xf32>
      %cst_18 = arith.constant dense<0.000000e+00> : vector<16xf32>
      %27 = vector.multi_reduction <add>, %26, %cst_18 [1] : vector<16x32xf32> to vector<16xf32>
      %28 = vector.shape_cast %27 : vector<16xf32> to vector<16x1xf32>
      %cst_19 = arith.constant 3.200000e+01 : f32
      %29 = vector.broadcast %cst_19 : f32 to vector<16x1xf32>
      %30 = arith.divf %28, %29 : vector<16x1xf32>
      %31 = vector.broadcast %23 : vector<16x1xf32> to vector<16x32xf32>
      %32 = arith.subf %19, %31 : vector<16x32xf32>
      %cst_20 = arith.constant 9.99999974E-6 : f32
      %33 = vector.broadcast %cst_20 : f32 to vector<16x1xf32>
      %34 = arith.addf %30, %33 : vector<16x1xf32>
      %35 = math.rsqrt %34 : vector<16x1xf32>
      %36 = vector.broadcast %35 : vector<16x1xf32> to vector<16x32xf32>
      %37 = arith.mulf %32, %36 : vector<16x32xf32>
      %c0_21 = arith.constant 0 : index
      %c0_22 = arith.constant 0 : index
      %38 = vector.load %arg6[%c0_21, %c0_22] : memref<1x32xf32, #tpu.memory_space<vmem>>, vector<1x32xf32>
      %39 = vector.broadcast %38 : vector<1x32xf32> to vector<16x32xf32>
      %40 = arith.mulf %37, %39 : vector<16x32xf32>
      %c0_23 = arith.constant 0 : index
      %c0_24 = arith.constant 0 : index
      %41 = vector.load %arg7[%c0_23, %c0_24] : memref<1x32xf32, #tpu.memory_space<vmem>>, vector<1x32xf32>
      %42 = vector.broadcast %41 : vector<1x32xf32> to vector<16x32xf32>
      %43 = arith.addf %40, %42 : vector<16x32xf32>
      %c0_25 = arith.constant 0 : index
      %c0_26 = arith.constant 0 : index
      %44 = vector.load %arg8[%c0_25, %c0_26] : memref<16x32xf32, #tpu.memory_space<vmem>>, vector<16x32xf32>
      tpu.vector_store %arg8[%c0_25, %c0_26], %43 {strides = array<i32>} : memref<16x32xf32, #tpu.memory_space<vmem>>, vector<16x32xf32>,
    } else {
    }
    return
  }
  func.func @transform_0(%arg0: i32, %arg1: i32) -> (i32, i32) {
    %c0_i32 = arith.constant 0 : i32
    return %arg0, %arg1 : i32, i32
  }
  func.func @transform_1(%arg0: i32, %arg1: i32) -> (i32, i32) {
    %c0_i32 = arith.constant 0 : i32
    %c0_i32_0 = arith.constant 0 : i32
    return %arg1, %c0_i32 : i32, i32
  }
  func.func @transform_2(%arg0: i32, %arg1: i32) -> (i32, i32) {
    %c0_i32 = arith.constant 0 : i32
    %c0_i32_0 = arith.constant 0 : i32
    %c0_i32_1 = arith.constant 0 : i32
    return %c0_i32, %c0_i32_0 : i32, i32
  }
  func.func @transform_3(%arg0: i32, %arg1: i32) -> (i32, i32) {
    %c0_i32 = arith.constant 0 : i32
    %c0_i32_0 = arith.constant 0 : i32
    return %arg0, %c0_i32 : i32, i32
  }
  func.func @transform_4(%arg0: i32, %arg1: i32) -> (i32, i32) {
    %c0_i32 = arith.constant 0 : i32
    %c0_i32_0 = arith.constant 0 : i32
    %c0_i32_1 = arith.constant 0 : i32
    return %c0_i32, %c0_i32_0 : i32, i32
  }
  func.func @transform_5(%arg0: i32, %arg1: i32) -> (i32, i32) {
    %c0_i32 = arith.constant 0 : i32
    %c0_i32_0 = arith.constant 0 : i32
    %c0_i32_1 = arith.constant 0 : i32
    return %c0_i32, %c0_i32_0 : i32, i32
  }
  func.func @transform_6(%arg0: i32, %arg1: i32) -> (i32, i32) {
    %c0_i32 = arith.constant 0 : i32
    %c0_i32_0 = arith.constant 0 : i32
    return %arg0, %c0_i32 : i32, i32
  }
}

module attributes {stable_mosaic.version = 11 : i64} {
  func.func @_ln_kernel(%arg0: i32, %arg1: memref<16x32xf32, #tpu.memory_space<vmem>>, %arg2: memref<1x32xf32, #tpu.memory_space<vmem>>, %arg3: memref<1x32xf32, #tpu.memory_space<vmem>>, %arg4: memref<16x32xf32, #tpu.memory_space<vmem>>) attributes {dimension_semantics = [#tpu.dimension_semantics<parallel>], iteration_bounds = array<i64: 1>, scalar_prefetch = 0 : i64, scratch_operands = 0 : i64, tpu.core_type = #tpu.core_type<tc>, window_params = [{transform_indices = @transform_0, window_bounds = array<i64: 16, 32>}, {pipeline_mode = #tpu.pipeline_mode<synchronous>, transform_indices = @transform_1, window_bounds = array<i64: 1, 32>}, {pipeline_mode = #tpu.pipeline_mode<synchronous>, transform_indices = @transform_2, window_bounds = array<i64: 1, 32>}, {transform_indices = @transform_3, window_bounds = array<i64: 16, 32>}]} {
    %c0 = arith.constant 0 : index
    %c0_0 = arith.constant 0 : index
    %0 = vector.load %arg1[%c0, %c0_0] : memref<16x32xf32, #tpu.memory_space<vmem>>, vector<16x32xf32>
    %cst = arith.constant dense<0.000000e+00> : vector<16xf32>
    %1 = vector.multi_reduction <add>, %0, %cst [1] : vector<16x32xf32> to vector<16xf32>
    %2 = vector.shape_cast %1 : vector<16xf32> to vector<16x1xf32>
    %cst_1 = arith.constant 3.200000e+01 : f32
    %3 = vector.broadcast %cst_1 : f32 to vector<16x1xf32>
    %4 = arith.divf %2, %3 : vector<16x1xf32>
    %5 = vector.broadcast %4 : vector<16x1xf32> to vector<16x32xf32>
    %6 = arith.subf %0, %5 : vector<16x32xf32>
    %7 = arith.mulf %6, %6 : vector<16x32xf32>
    %cst_2 = arith.constant dense<0.000000e+00> : vector<16xf32>
    %8 = vector.multi_reduction <add>, %7, %cst_2 [1] : vector<16x32xf32> to vector<16xf32>
    %9 = vector.shape_cast %8 : vector<16xf32> to vector<16x1xf32>
    %cst_3 = arith.constant 3.200000e+01 : f32
    %10 = vector.broadcast %cst_3 : f32 to vector<16x1xf32>
    %11 = arith.divf %9, %10 : vector<16x1xf32>
    %12 = vector.broadcast %4 : vector<16x1xf32> to vector<16x32xf32>
    %13 = arith.subf %0, %12 : vector<16x32xf32>
    %cst_4 = arith.constant 9.99999974E-6 : f32
    %14 = vector.broadcast %cst_4 : f32 to vector<16x1xf32>
    %15 = arith.addf %11, %14 : vector<16x1xf32>
    %16 = math.rsqrt %15 : vector<16x1xf32>
    %17 = vector.broadcast %16 : vector<16x1xf32> to vector<16x32xf32>
    %18 = arith.mulf %13, %17 : vector<16x32xf32>
    %c0_5 = arith.constant 0 : index
    %c0_6 = arith.constant 0 : index
    %19 = vector.load %arg2[%c0_5, %c0_6] : memref<1x32xf32, #tpu.memory_space<vmem>>, vector<1x32xf32>
    %20 = vector.broadcast %19 : vector<1x32xf32> to vector<16x32xf32>
    %21 = arith.mulf %18, %20 : vector<16x32xf32>
    %c0_7 = arith.constant 0 : index
    %c0_8 = arith.constant 0 : index
    %22 = vector.load %arg3[%c0_7, %c0_8] : memref<1x32xf32, #tpu.memory_space<vmem>>, vector<1x32xf32>
    %23 = vector.broadcast %22 : vector<1x32xf32> to vector<16x32xf32>
    %24 = arith.addf %21, %23 : vector<16x32xf32>
    %c0_9 = arith.constant 0 : index
    %c0_10 = arith.constant 0 : index
    %25 = vector.load %arg4[%c0_9, %c0_10] : memref<16x32xf32, #tpu.memory_space<vmem>>, vector<16x32xf32>
    tpu.vector_store %arg4[%c0_9, %c0_10], %24 {strides = array<i32>} : memref<16x32xf32, #tpu.memory_space<vmem>>, vector<16x32xf32>,
    return
  }
  func.func @transform_0(%arg0: i32) -> (i32, i32) {
    %c0_i32 = arith.constant 0 : i32
    %c0_i32_0 = arith.constant 0 : i32
    return %arg0, %c0_i32 : i32, i32
  }
  func.func @transform_1(%arg0: i32) -> (i32, i32) {
    %c0_i32 = arith.constant 0 : i32
    %c0_i32_0 = arith.constant 0 : i32
    %c0_i32_1 = arith.constant 0 : i32
    return %c0_i32, %c0_i32_0 : i32, i32
  }
  func.func @transform_2(%arg0: i32) -> (i32, i32) {
    %c0_i32 = arith.constant 0 : i32
    %c0_i32_0 = arith.constant 0 : i32
    %c0_i32_1 = arith.constant 0 : i32
    return %c0_i32, %c0_i32_0 : i32, i32
  }
  func.func @transform_3(%arg0: i32) -> (i32, i32) {
    %c0_i32 = arith.constant 0 : i32
    %c0_i32_0 = arith.constant 0 : i32
    return %arg0, %c0_i32 : i32, i32
  }
}

</mosaic_0001>

<bundles_post_ra>
// kernel: transformer_encoder.15
= control target key start
LH: loop header
LB: loop body
LE: loop exit
PB: predicated region body
PF: predicated region fallthrough
CT: control target
= control target key end

     0   :  { %8 = vsyncpa [#allocation4], 0  ;;  %s121_s15 = smov [#allocation3]   ;;  %s122_s17 = smov 128   ;;  %s170_s0 = inlined_call_operand.vmem [shape: f32[16,32], index: 0, kind: input, shape index: {}]   ;;  %s171_s1 = inlined_call_operand.hbm [shape: f32[32,32], index: 1, kind: input, shape index: {}]   ;;  %s172_s2 = inlined_call_operand.vmem [shape: f32[1,32], index: 2, kind: input, shape index: {}]   ;;  %s173_s3 = inlined_call_operand.vmem [shape: f32[16,32], index: 3, kind: output, shape index: {}]  }
   0x1   :  { %s15_s14 = sshll.u32 %s171_s1, 4  ;;  %s17_s16 = sshll.u32 %s121_s15, 4  ;;  %s16_s14 = int_to_ptr.hbm [resolvable:$true] %s15_s14  ;;  %s18_s16 = int_to_ptr.vmem [resolvable:$true] %s17_s16 }
   0x2   :  { %s123_s18 = smov 8  }
   0x3   :  { %23 = dma.hbm_to_vmem [thread:$0]  %s16_s14, 512, %s18_s16, [#allocation4], %s122_s17, %s122_s17, %s123_s18  }
   0x4   :  { %119 = dma.done.wait [#allocation4], 512  }
   0x5   :  { %120 = vsyncadd [#allocation4], 4294966784  ;;  %vm35_vm0 = vcmask 261120   ;;  %v124_v0 = vmov 0.0   ;;  %v45_v1 = vld [vmem:[#allocation3 + $0x10] sm:$0xff]  ;;  %v46_v2 = vld [vmem:[#allocation3 + $0x18] sm:$0xff] }
   0x6   :  { %36 = vst.msk [vmem:[#allocation2] sm:$0xff] %vm35_vm0, %v124_v0  ;;  %v43_v3 = vld [vmem:[#allocation3] sm:$0xff]  ;;  %v48_v4 = vpack.c.bf16 %v46_v2, %v45_v1  ;;  %v44_v5 = vld [vmem:[#allocation3 + $0x8] sm:$0xff]  ;;  %v40_v7 = vld [vmem:[%s170_s0] sm:$0xff] }
   0x7   :  { %37 = vst.msk [vmem:[#allocation2 + $0x8] sm:$0xff] %vm35_vm0, %v124_v0  ;;  %v47_v6 = vpack.c.bf16 %v44_v5, %v43_v3  ;;  %v41_v8 = vld [vmem:[%s170_s0 + $0x8] sm:$0xff]  ;;  %v94_v14 = vld [vmem:[%s172_s2] ss:$0 sm:$0xff] }
   0x8   :  { %59 = vmatpush.bf16.msra.mxu0 %v48_v4  ;;  %v42_v9 = vpack.c.bf16 %v41_v8, %v40_v7 }
   0xc   :  { %60 = vmatpush.bf16.msra.mxu0 %v47_v6 }
   0xd   :  { %v38_v10 = vld [vmem:[#allocation2] sm:$0xff] }
   0xe   :  { %v39_v13 = vld [vmem:[#allocation2 + $0x8] sm:$0xff] }
   0xf   :  { %89 = vmatmul.msk.bf16.vlgmr.msra.gmra.mxu0 %vm35_vm0, %v42_v9 }
  0x8c   :  { %v62_v11 = vpop.f32.mrf.mxu0 }
  0x8d   :  { %v67_v12 = vadd.f32 %v62_v11, %v38_v10 }
  0x8f   :  { %69 = vst.msk [vmem:[#allocation2] sm:$0xff] %vm35_vm0, %v67_v12 }
  0x94   :  { %v64_v15 = vpop.f32.mrf.mxu0 }
  0x95   :  { %v68_v16 = vadd.f32 %v64_v15, %v39_v13 }
  0x96   :  { %v74_v17 = vld [vmem:[#allocation2] sm:$0xff] }
  0x97   :  { %v80_v18 = vadd.f32 %v94_v14, %v74_v17  ;;  %70 = vst.msk [vmem:[#allocation2 + $0x8] sm:$0xff] %vm35_vm0, %v68_v16 }
  0x99   :  { %82 = vst.msk [vmem:[%s173_s3] sm:$0xff] %vm35_vm0, %v80_v18 }
  0x9e   :  { %v75_v19 = vld [vmem:[#allocation2 + $0x8] sm:$0xff] }
  0x9f   :  { %v81_v20 = vadd.f32 %v94_v14, %v75_v19 }
  0xa1   :  { %83 = vst.msk [vmem:[%s173_s3 + $0x8] sm:$0xff] %vm35_vm0, %v81_v20 }
  0xa2   :  { %88 = vsyncpa [#allocation4], 1 }

// kernel: transformer_encoder.22
= control target key start
LH: loop header
LB: loop body
LE: loop exit
PB: predicated region body
PF: predicated region fallthrough
CT: control target
= control target key end

     0   :  { %vm19_vm0 = vcmask 523264   ;;  %v76_v3 = vmov 0.0   ;;  %vm33_vm1 = vcmask 261120   ;;  %s130_s1 = inlined_call_operand.vmem [shape: f32[32,64], index: 1, kind: input, shape index: {}]   ;;  %s131_s0 = inlined_call_operand.vmem [shape: f32[16,32], index: 0, kind: input, shape index: {}]   ;;  %s132_s2 = inlined_call_operand.vmem [shape: f32[1,64], index: 2, kind: input, shape index: {}]   ;;  %s133_s3 = inlined_call_operand.vmem [shape: f32[16,64], index: 3, kind: output, shape index: {}]  }
   0x1   :  { %v29_v0 = vld [vmem:[%s130_s1 + $0x10] sm:$0xff]  ;;  %v30_v1 = vld [vmem:[%s130_s1 + $0x18] sm:$0xff]  ;;  %v27_v2 = vld [vmem:[%s130_s1] sm:$0xff]  ;;  %20 = vst.msk [vmem:[#allocation2] sm:$0xff] %vm19_vm0, %v76_v3 }
   0x2   :  { %v32_v4 = vpack.c.bf16 %v30_v1, %v29_v0  ;;  %v28_v5 = vld [vmem:[%s130_s1 + $0x8] sm:$0xff]  ;;  %21 = vst.msk [vmem:[#allocation2 + $0x8] sm:$0xff] %vm19_vm0, %v76_v3  ;;  %v24_v7 = vld [vmem:[%s131_s0] sm:$0xff] }
   0x3   :  { %v31_v6 = vpack.c.bf16 %v28_v5, %v27_v2  ;;  %v25_v8 = vld [vmem:[%s131_s0 + $0x8] sm:$0xff]  ;;  %v75_v14 = vld [vmem:[%s132_s2] ss:$0 sm:$0xff] }
   0x4   :  { %43 = vmatpush.bf16.msra.mxu0 %v32_v4  ;;  %v26_v9 = vpack.c.bf16 %v25_v8, %v24_v7 }
   0x8   :  { %44 = vmatpush.bf16.msra.mxu0 %v31_v6  ;;  %v22_v10 = vld [vmem:[#allocation2] sm:$0xff] }
   0x9   :  { %v23_v13 = vld [vmem:[#allocation2 + $0x8] sm:$0xff] }
   0xb   :  { %73 = vmatmul.msk.bf16.vlgmr.msra.gmra.mxu0 %vm33_vm1, %v26_v9 }
  0x88   :  { %v46_v11 = vpop.f32.mrf.mxu0 }
  0x89   :  { %v51_v12 = vadd.f32 %v46_v11, %v22_v10 }
  0x8b   :  { %54 = vst.msk [vmem:[#allocation2] sm:$0xff] %vm19_vm0, %v51_v12 }
  0x90   :  { %v48_v15 = vpop.f32.mrf.mxu0 }
  0x91   :  { %v52_v16 = vadd.f32 %v48_v15, %v23_v13 }
  0x92   :  { %v59_v17 = vld [vmem:[#allocation2] sm:$0xff] }
  0x93   :  { %v65_v18 = vadd.f32 %v75_v14, %v59_v17  ;;  %55 = vst.msk [vmem:[#allocation2 + $0x8] sm:$0xff] %vm19_vm0, %v52_v16 }
  0x95   :  { %67 = vst.msk [vmem:[%s133_s3] sm:$0xff] %vm19_vm0, %v65_v18 }
  0x9a   :  { %v60_v19 = vld [vmem:[#allocation2 + $0x8] sm:$0xff] }
  0x9b   :  { %v66_v20 = vadd.f32 %v75_v14, %v60_v19 }
  0x9d   :  { %68 = vst.msk [vmem:[%s133_s3 + $0x8] sm:$0xff] %vm19_vm0, %v66_v20 }

// kernel: transformer_encoder.14
= control target key start
LH: loop header
LB: loop body
LE: loop exit
PB: predicated region body
PF: predicated region fallthrough
CT: control target
= control target key end

     0   :  { %8 = vsyncpa [#allocation4], 0  ;;  %s248_s0 = inlined_call_operand.hbm [shape: f32[16,16], index: 0, kind: input, shape index: {}]   ;;  %s249_s1 = inlined_call_operand.hbm [shape: f32[16,64], index: 1, kind: input, shape index: {}]   ;;  %s250_s2 = inlined_call_operand.hbm [shape: f32[1,64], index: 2, kind: input, shape index: {}]   ;;  %s251_s3 = inlined_call_operand.vmem [shape: f32[16,64], index: 3, kind: output, shape index: {}]  }
   0x1   :  { %9 = vsyncpa [#allocation6], 0  ;;  %s27_s14 = sshll.u32 %s249_s1, 4  ;;  %s201_s15 = smov [#allocation5]   ;;  %s28_s14 = int_to_ptr.hbm [resolvable:$true] %s27_s14 }
   0x2   :  { %s29_s16 = sshll.u32 %s201_s15, 4  ;;  %s14_s19 = sshll.u32 %s248_s0, 4  ;;  %s30_s16 = int_to_ptr.vmem [resolvable:$true] %s29_s16  ;;  %s15_s19 = int_to_ptr.hbm [resolvable:$true] %s14_s19 }
   0x3   :  { %s202_s20 = smov 128   ;;  %s203_s21 = smov 8  }
   0x4   :  { %35 = dma.hbm_to_vmem [thread:$0]  %s28_s14, 256, %s30_s16, [#allocation6], %s202_s20, %s202_s20, %s203_s21  }
   0x5   :  { %s204_s22 = smov [#allocation3]   ;;  %s41_s26 = sshll.u32 %s250_s2, 4  ;;  %s42_s26 = int_to_ptr.hbm [resolvable:$true] %s41_s26 }
   0x6   :  { %s16_s23 = sshll.u32 %s204_s22, 4  ;;  %s205_s1 = smov [#allocation7]   ;;  %s17_s23 = int_to_ptr.vmem [resolvable:$true] %s16_s23 }
   0x7   :  { %22 = dma.hbm_to_vmem [thread:$0]  %s15_s19, 256, %s17_s23, [#allocation4], %s202_s20, %s202_s20, %s203_s21  }
   0x8   :  { %s43_s27 = sshll.u32 %s205_s1, 4  ;;  %s44_s27 = int_to_ptr.vmem [resolvable:$true] %s43_s27 }
   0x9   :  { %46 = dma.hbm_to_vmem [thread:$0]  %s42_s26, 16, %s44_s27, [#allocation6]  }
   0xa   :  { %197 = dma.done.wait [#allocation4], 256  }
   0xb   :  { %198 = vsyncadd [#allocation4], 4294967040 }
   0xc   :  { %199 = dma.done.wait [#allocation6], 272  }
   0xd   :  { %200 = vsyncadd [#allocation6], 4294967024  ;;  %vm64_vm0 = vcmask 523264   ;;  %v206_v0 = vmov 0.0   ;;  %v72_v1 = vld [vmem:[#allocation5] sm:$0xff]  ;;  %v73_v2 = vld [vmem:[#allocation5 + $0x8] sm:$0xff] }
   0xe   :  { %65 = vst.msk [vmem:[#allocation2] sm:$0xff] %vm64_vm0, %v206_v0  ;;  %v69_v3 = vld [vmem:[#allocation3] sm:$0xff]  ;;  %v74_v4 = vpack.c.bf16 %v73_v2, %v72_v1  ;;  %v70_v5 = vld [vmem:[#allocation3 + $0x8] sm:$0xff]  ;;  %vm75_vm1 = vcmask 130048  }
   0xf   :  { %66 = vst.msk [vmem:[#allocation2 + $0x8] sm:$0xff] %vm64_vm0, %v206_v0  ;;  %v71_v6 = vpack.c.bf16 %v70_v5, %v69_v3  ;;  %v124_v11 = vld [vmem:[#allocation7] ss:$0 sm:$0xff] }
  0x10   :  { %86 = vmatpush.bf16.msra.mxu0 %v74_v4 }
  0x13   :  { %117 = vmatmul.msk.bf16.vlgmr.msra.gmra.mxu0 %vm75_vm1, %v71_v6 }
  0x15   :  { %v67_v7 = vld [vmem:[#allocation2] sm:$0xff] }
  0x16   :  { %v68_v10 = vld [vmem:[#allocation2 + $0x8] sm:$0xff] }
  0x90   :  { %v88_v8 = vpop.f32.mrf.mxu0 }
  0x91   :  { %v93_v9 = vadd.f32 %v88_v8, %v67_v7 }
  0x93   :  { %96 = vst.msk [vmem:[#allocation2] sm:$0xff] %vm64_vm0, %v93_v9 }
  0x98   :  { %v90_v12 = vpop.f32.mrf.mxu0 }
  0x99   :  { %v94_v13 = vadd.f32 %v90_v12, %v68_v10 }
  0x9a   :  { %v101_v14 = vld [vmem:[#allocation2] sm:$0xff] }
  0x9b   :  { %v107_v15 = vadd.f32 %v124_v11, %v101_v14  ;;  %97 = vst.msk [vmem:[#allocation2 + $0x8] sm:$0xff] %vm64_vm0, %v94_v13 }
  0x9d   :  { %109 = vst.msk [vmem:[%s251_s3] sm:$0xff] %vm64_vm0, %v107_v15 }
  0xa2   :  { %v102_v16 = vld [vmem:[#allocation2 + $0x8] sm:$0xff] }
  0xa3   :  { %v108_v17 = vadd.f32 %v124_v11, %v102_v16 }
  0xa5   :  { %110 = vst.msk [vmem:[%s251_s3 + $0x8] sm:$0xff] %vm64_vm0, %v108_v17 }
  0xa6   :  { %115 = vsyncpa [#allocation4], 1 }
  0xa7   :  { %116 = vsyncpa [#allocation6], 1 }

// kernel: transformer_encoder.17
= control target key start
LH: loop header
LB: loop body
LE: loop exit
PB: predicated region body
PF: predicated region fallthrough
CT: control target
= control target key end

     0   :  { %s558_s9 = smov 0   ;;  %s621_s0 = inlined_call_operand.vmem [shape: f32[2,8,32], index: 0, kind: input, shape index: {}]   ;;  %s622_s1 = inlined_call_operand.vmem [shape: f32[2,8,64], index: 1, kind: input, shape index: {}]   ;;  %s623_s2 = inlined_call_operand.vmem [shape: f32[2,8,32], index: 2, kind: output, shape index: {}]  }
   0x1 LB: > { %s473_s10 = sadd.s32 4294967295, %s531_s9   ;;  %p477_p0 = scmp.ge.s32.totalorder %s531_s9, 1  ;;  %s531_s9 = sphi %s558_s9, %s12_s9  }
   0x2   : > { %p120_p1 = scmp.lt.s32.totalorder %s531_s9, 3 }
   0x4   : > { %p121_p2 = pnand %p477_p0, %p120_p1 }
   0x5   : > { %p144_p3 = scmp.lt.s32.totalorder (!%p121_p2), %s473_s10, 1  ;;  %s533_s18 = smov (!%p121_p2), 96  }
   0x6   : > { %124 = sbr.rel (%p121_p2) target bundleno = 1078 (0x436), region = 28  ;;  %s534_s19 = smov (!%p121_p2), 112  }
   0x7   : > { %s535_s20 = smov (!%p121_p2), 104   ;;  %s536_s21 = smov (!%p121_p2), 120  }
   0x8   : > { %s537_s22 = smov (!%p121_p2), 88   ;;  %s538_s23 = smov (!%p121_p2), 80  }
   0x9   : > { %s539_s24 = smov (!%p121_p2), 72   ;;  %s540_s25 = smov (!%p121_p2), 8  }
   0xa   : > { %s541_s26 = smov (!%p121_p2), 24   ;;  %s542_s27 = smov (!%p121_p2), 16  }
   0xb   : > { %s625_s10 = smov (!%p144_p3, %s473_s10), 1  ;;  %vm161_vm0 = vcmask 64512   ;;  %vm200_vm1 = vcmask 1043456   ;;  %vm402_vm2 = vcmask 130048   ;;  %vm404_vm3 = vcmask 195584  }
   0xc   : > { %s566_s11 = sshll.u32 %s625_s10, 3  ;;  %vm406_vm4 = vcmask 261120  }
   0xd   : > { %s151_s14 = scalar_lea.vmem %s622_s1, %s566_s11  ;;  %s147_s17 = scalar_lea.vmem %s621_s0, %s566_s11 }
   0xe   : > { %v158_v0 = vld [vmem:[%s151_s14] sm:$0xff]  ;;  %s155_s30 = scalar_lea.vmem %s623_s2, %s566_s11 }
   0xf   : > { %v572_v1 = vpack.c.bf16 %v158_v0, %v158_v0  ;;  %v157_v3 = vld [vmem:[%s147_s17] sm:$0xff] }
  0x10   : > { %v159_v4 = vpack.c.bf16 %v157_v3, %v157_v3 }
  0x11   : > { %v166_v2 = vsel %vm161_vm0, %v572_v1, 0  ;;  %195 = vrot.lane.b32.xlu2 %v572_v1, %s533_s18 }
  0x12   : > { %175 = vmatpush.bf16.xpose.msra.mxu0 %v166_v2 }
  0x19   : > { %481 = vmatmul.msk.bf16.vlgmr.msra.gmra.mxu0 %vm161_vm0, %v159_v4  ;;  %277 = vrot.lane.b32.xlu2 %v572_v1, %s534_s19 }
  0x21   : > { %334 = vrot.lane.b32.xlu2 %v572_v1, %s535_s20 }
  0x29   : > { %275 = vrot.lane.b32.xlu2 %v159_v4, %s534_s19 }
  0x6b   : > { %v196_v9 = vpop.permute.xlu2 %195 }
  0x6c   : > { %v202_v20 = vsel %vm200_vm1, %v196_v9, 0 }
  0x6d   : > { %211 = vmatpush.bf16.msra.mxu1 %v202_v20 }
  0x73   : > { %v278_v10 = vpop.permute.xlu2 %277 }
  0x74   : > { %v283_v21 = vsel %vm161_vm0, %v278_v10, 0 }
  0x75   : > { %292 = vmatpush.bf16.xpose.msrb.mxu1 %v283_v21 }
  0x7b   : > { %v335_v14 = vpop.permute.xlu2 %334 }
  0x7c   : > { %v340_v15 = vsel %vm161_vm0, %v335_v14, 0 }
  0x7d   : > { %349 = vmatpush.bf16.xpose.msrb.mxu0 %v340_v15 }
  0x83   : > { %v276_v28 = vpop.permute.xlu2 %275 }
  0x96   : > { %v177_v5 = vpop.f32.mrf.mxu0 }
  0x97   : > { %v181_v6 = vmul.f32 0.35355338, %v177_v5 }
  0x99   : > { %v182_v7 = vsel %vm161_vm0, %v181_v6, -inf }
  0x9a   : > { %183 = vmax.xlane.f32.xlu0 %v182_v7 }
  0x9e   : > { %v179_v8 = vpop.f32.mrf.mxu0 }
  0xae   : > { %220 = vrot.lane.b32.xlu0 %v572_v1, %s536_s21 }
  0xb6   : > { %332 = vrot.lane.b32.xlu0 %v159_v4, %s535_s20 }
 0x10d   : > { %v184_v11 = vpop.xlane.xlu0 %183 }
 0x10e   : > { %v185_v12 = vsub.f32 %v181_v6, %v184_v11 }
 0x110   : > { %v186_v13 = vmul.f32 1.442695, %v185_v12 }
 0x112   : > { %509 = vpow2.f32 %v186_v13 }
 0x118   : > { %v510_v16 = vpop.eup %509 }
 0x119   : > { %v188_v17 = vsel %vm161_vm0, %v510_v16, 0.0 }
 0x11a   : > { %189 = vadd.xlane.f32.xlu1 %v188_v17 }
 0x120   : > { %v221_v18 = vpop.permute.xlu0 %220 }
 0x121   : > { %v226_v22 = vsel %vm161_vm0, %v221_v18, 0 }
 0x122   : > { %235 = vmatpush.bf16.xpose.msra.mxu2 %v226_v22 }
 0x128   : > { %v333_v19 = vpop.permute.xlu0 %332 }
 0x129   : > { %487 = vmatmul.msk.bf16.vlgmr.msrb.gmra.mxu0 %vm161_vm0, %v333_v19 }
 0x133   : > { %218 = vrot.lane.b32.xlu1 %v159_v4, %s536_s21 }
 0x18d   : > { %v190_v23 = vpop.xlane.xlu1 %189 }
 0x18e   : > { %511 = vrcp.f32 %v190_v23 }
 0x194   : > { %v512_v24 = vpop.eup %511 }
 0x195   : > { %v192_v25 = vmul.f32 %v512_v24, %v510_v16 }
 0x197   : > { %v193_v26 = vpack.c.bf16 %v192_v25, %v192_v25 }
 0x199   : > { %482 = vmatmul.msk.bf16.vlgmr.msra.gmra.mxu1 %vm161_vm0, %v193_v26 }
 0x1a5   : > { %v219_v27 = vpop.permute.xlu1 %218 }
 0x1a6   : > { %483 = vmatmul.msk.bf16.vlgmr.msra.gmra.mxu2 %vm161_vm0, %v219_v27  ;;  %v351_v29 = vpop.f32.mrf.mxu0 }
 0x1a7   : > { %v355_v30 = vmul.f32 0.35355338, %v351_v29 }
 0x1a9   : > { %485 = vmatmul.msk.bf16.vlgmr.msrb.gmra.mxu1 %vm161_vm0, %v276_v28  ;;  %v356_v31 = vsel %vm161_vm0, %v355_v30, -inf }
 0x1aa   : > { %357 = vmax.xlane.f32.xlu0 %v356_v31 }
 0x1ae   : > { %v353_v32 = vpop.f32.mrf.mxu0 }
 0x216   : > { %v596_v33 = vpop.f32.mrf.mxu1 }
 0x21d   : > { %v358_v45 = vpop.xlane.xlu0 %357 }
 0x21e   : > { %v215_v34 = vpop.f32.mrf.mxu1  ;;  %v359_v49 = vsub.f32 %v355_v30, %v358_v45 }
 0x220   : > { %v360_v51 = vmul.f32 1.442695, %v359_v49 }
 0x226   : > { %v294_v35 = vpop.f32.mrf.mxu1 }
 0x227   : > { %v298_v36 = vmul.f32 0.35355338, %v294_v35 }
 0x229   : > { %v237_v37 = vpop.f32.mrf.mxu2  ;;  %v299_v38 = vsel %vm161_vm0, %v298_v36, -inf }
 0x22a   : > { %v241_v39 = vmul.f32 0.35355338, %v237_v37  ;;  %300 = vmax.xlane.f32.xlu1 %v299_v38 }
 0x22c   : > { %v242_v40 = vsel %vm161_vm0, %v241_v39, -inf }
 0x22d   : > { %243 = vmax.xlane.f32.xlu2 %v242_v40 }
 0x22e   : > { %v296_v41 = vpop.f32.mrf.mxu1 }
 0x231   : > { %v239_v42 = vpop.f32.mrf.mxu2 }
 0x243   : > { %254 = vrot.lane.b32.xlu1 %v572_v1, %s537_s22 }
 0x29d   : > { %v301_v43 = vpop.xlane.xlu1 %300 }
 0x29e   : > { %v302_v44 = vsub.f32 %v298_v36, %v301_v43 }
 0x2a0   : > { %v303_v46 = vmul.f32 1.442695, %v302_v44  ;;  %v244_v47 = vpop.xlane.xlu2 %243 }
 0x2a1   : > { %v245_v48 = vsub.f32 %v241_v39, %v244_v47 }
 0x2a2   : > { %513 = vpow2.f32 %v303_v46 }
 0x2a3   : > { %v246_v50 = vmul.f32 1.442695, %v245_v48 }
 0x2a5   : > { %515 = vpow2.f32 %v246_v50 }
 0x2a6   : > { %517 = vpow2.f32 %v360_v51 }
 0x2a8   : > { %v514_v52 = vpop.eup %513 }
 0x2a9   : > { %v305_v53 = vsel %vm161_vm0, %v514_v52, 0.0 }
 0x2aa   : > { %306 = vadd.xlane.f32.xlu0 %v305_v53 }
 0x2ab   : > { %v516_v54 = vpop.eup %515 }
 0x2ac   : > { %v248_v55 = vsel %vm161_vm0, %v516_v54, 0.0  ;;  %v518_v56 = vpop.eup %517 }
 0x2ad   : > { %249 = vadd.xlane.f32.xlu2 %v248_v55  ;;  %v362_v57 = vsel %vm161_vm0, %v518_v56, 0.0 }
 0x2b5   : > { %363 = vadd.xlane.f32.xlu2 %v362_v57  ;;  %v255_v58 = vpop.permute.xlu1 %254 }
 0x2b6   : > { %v260_v59 = vsel %vm200_vm1, %v255_v58, 0 }
 0x2b7   : > { %269 = vmatpush.bf16.msra.mxu3 %v260_v59 }
 0x2be   : > { %311 = vrot.lane.b32.xlu0 %v572_v1, %s538_s23 }
 0x2cd   : > { %368 = vrot.lane.b32.xlu2 %v572_v1, %s539_s24 }
 0x31d   : > { %v307_v62 = vpop.xlane.xlu0 %306 }
 0x320   : > { %v250_v60 = vpop.xlane.xlu2 %249 }
 0x321   : > { %519 = vrcp.f32 %v250_v60 }
 0x327   : > { %v520_v61 = vpop.eup %519 }
 0x328   : > { %v364_v63 = vpop.xlane.xlu2 %363  ;;  %v252_v0 = vmul.f32 %v520_v61, %v516_v54 }
 0x329   : > { %521 = vrcp.f32 %v364_v63 }
 0x32a   : > { %v253_v2 = vpack.c.bf16 %v252_v0, %v252_v0  ;;  %523 = vrcp.f32 %v307_v62 }
 0x32c   : > { %484 = vmatmul.msk.bf16.vlgmr.msra.gmra.mxu3 %vm161_vm0, %v253_v2 }
 0x32f   : > { %v522_v3 = vpop.eup %521 }
 0x330   : > { %v366_v4 = vmul.f32 %v522_v3, %v518_v56  ;;  %v369_v5 = vpop.permute.xlu2 %368  ;;  %v312_v6 = vpop.permute.xlu0 %311 }
 0x331   : > { %v317_v1 = vsel %vm200_vm1, %v312_v6, 0  ;;  %v374_v7 = vsel %vm200_vm1, %v369_v5, 0  ;;  %v524_v9 = vpop.eup %523 }
 0x332   : > { %326 = vmatpush.bf16.msrb.mxu3 %v317_v1  ;;  %383 = vmatpush.bf16.msrb.mxu2 %v374_v7  ;;  %v367_v8 = vpack.c.bf16 %v366_v4, %v366_v4  ;;  %v309_v10 = vmul.f32 %v524_v9, %v514_v52 }
 0x334   : > { %v310_v11 = vpack.c.bf16 %v309_v10, %v309_v10 }
 0x335   : > { %488 = vmatmul.msk.bf16.vlgmr.msrb.gmra.mxu2 %vm161_vm0, %v367_v8 }
 0x33c   : > { %486 = vmatmul.msk.bf16.vlgmr.msrb.gmra.mxu3 %vm161_vm0, %v310_v11 }
 0x3af   : > { %v271_v12 = vpop.f32.mrf.mxu3 }
 0x3b0   : > { %390 = vrot.lane.b32.xlu1 %v271_v12, %s540_s25 }
 0x3b7   : > { %v273_v13 = vpop.f32.mrf.mxu3 }
 0x3b8   : > { %v385_v14 = vpop.f32.mrf.mxu2 }
 0x3b9   : > { %398 = vrot.lane.b32.xlu1 %v385_v14, %s541_s26 }
 0x3bf   : > { %v328_v15 = vpop.f32.mrf.mxu3 }
 0x3c0   : > { %v387_v16 = vpop.f32.mrf.mxu2  ;;  %394 = vrot.lane.b32.xlu0 %v328_v15, %s542_s27 }
 0x3c7   : > { %v330_v17 = vpop.f32.mrf.mxu3 }
 0x422   : > { %v391_v18 = vpop.permute.xlu1 %390 }
 0x423   : > { %v401_v19 = vsel %vm161_vm0, %v596_v33, %v391_v18 }
 0x42b   : > { %v399_v21 = vpop.permute.xlu1 %398 }
 0x432   : > { %v395_v20 = vpop.permute.xlu0 %394 }
 0x433   : > { %v403_v22 = vsel %vm402_vm2, %v401_v19, %v395_v20 }
 0x434   : > { %v405_v23 = vsel %vm404_vm3, %v403_v22, %v399_v21 }
 0x435   : > { %407 = vst.msk [vmem:[%s155_s30] sm:$0xff] %vm406_vm4, %v405_v23 }
 0x436 PF: > { %s12_s9 = sadd.s32 1, %s531_s9  }
 0x437   : > { %p9_p4 = scmp.ge.s32.totalorder %s12_s9, 4  }
 0x439   :  { %11 = sbr.rel (!%p9_p4) target bundleno = 1 (0x1), region = 61 }

// kernel: transformer_encoder.19
= control target key start
LH: loop header
LB: loop body
LE: loop exit
PB: predicated region body
PF: predicated region fallthrough
CT: control target
= control target key end

     0   :  { %8 = vsyncpa [#allocation4], 0  ;;  %s124_s15 = smov [#allocation3]   ;;  %s125_s17 = smov 128   ;;  %s172_s0 = inlined_call_operand.vmem [shape: f32[16,32], index: 0, kind: input, shape index: {}]   ;;  %s173_s1 = inlined_call_operand.hbm [shape: f32[32,64], index: 1, kind: input, shape index: {}]   ;;  %s174_s2 = inlined_call_operand.vmem [shape: f32[1,64], index: 2, kind: input, shape index: {}]   ;;  %s175_s3 = inlined_call_operand.vmem [shape: f32[16,64], index: 3, kind: output, shape index: {}]  }
   0x1   :  { %s15_s14 = sshll.u32 %s173_s1, 4  ;;  %s17_s16 = sshll.u32 %s124_s15, 4  ;;  %s16_s14 = int_to_ptr.hbm [resolvable:$true] %s15_s14  ;;  %s18_s16 = int_to_ptr.vmem [resolvable:$true] %s17_s16 }
   0x2   :  { %s126_s18 = smov 8  }
   0x3   :  { %23 = dma.hbm_to_vmem [thread:$0]  %s16_s14, 512, %s18_s16, [#allocation4], %s125_s17, %s125_s17, %s126_s18  }
   0x4   :  { %122 = dma.done.wait [#allocation4], 512  }
   0x5   :  { %123 = vsyncadd [#allocation4], 4294966784  ;;  %vm35_vm0 = vcmask 523264   ;;  %v127_v0 = vmov 0.0   ;;  %v45_v1 = vld [vmem:[#allocation3 + $0x10] sm:$0xff]  ;;  %v46_v2 = vld [vmem:[#allocation3 + $0x18] sm:$0xff] }
   0x6   :  { %36 = vst.msk [vmem:[#allocation2] sm:$0xff] %vm35_vm0, %v127_v0  ;;  %v43_v3 = vld [vmem:[#allocation3] sm:$0xff]  ;;  %v48_v4 = vpack.c.bf16 %v46_v2, %v45_v1  ;;  %v44_v5 = vld [vmem:[#allocation3 + $0x8] sm:$0xff]  ;;  %v40_v7 = vld [vmem:[%s172_s0] sm:$0xff]  ;;  %vm49_vm1 = vcmask 261120  }
   0x7   :  { %37 = vst.msk [vmem:[#allocation2 + $0x8] sm:$0xff] %vm35_vm0, %v127_v0  ;;  %v47_v6 = vpack.c.bf16 %v44_v5, %v43_v3  ;;  %v41_v8 = vld [vmem:[%s172_s0 + $0x8] sm:$0xff]  ;;  %v97_v14 = vld [vmem:[%s174_s2] ss:$0 sm:$0xff] }
   0x8   :  { %59 = vmatpush.bf16.msra.mxu0 %v48_v4  ;;  %v42_v9 = vpack.c.bf16 %v41_v8, %v40_v7 }
   0xc   :  { %60 = vmatpush.bf16.msra.mxu0 %v47_v6 }
   0xd   :  { %v38_v10 = vld [vmem:[#allocation2] sm:$0xff] }
   0xe   :  { %v39_v13 = vld [vmem:[#allocation2 + $0x8] sm:$0xff] }
   0xf   :  { %92 = vmatmul.msk.bf16.vlgmr.msra.gmra.mxu0 %vm49_vm1, %v42_v9 }
  0x8c   :  { %v62_v11 = vpop.f32.mrf.mxu0 }
  0x8d   :  { %v67_v12 = vadd.f32 %v62_v11, %v38_v10 }
  0x8f   :  { %70 = vst.msk [vmem:[#allocation2] sm:$0xff] %vm35_vm0, %v67_v12 }
  0x94   :  { %v64_v15 = vpop.f32.mrf.mxu0 }
  0x95   :  { %v68_v16 = vadd.f32 %v64_v15, %v39_v13 }
  0x96   :  { %v75_v17 = vld [vmem:[#allocation2] sm:$0xff] }
  0x97   :  { %v81_v18 = vadd.f32 %v97_v14, %v75_v17  ;;  %71 = vst.msk [vmem:[#allocation2 + $0x8] sm:$0xff] %vm35_vm0, %v68_v16 }
  0x99   :  { %v83_v19 = vmax.f32 %v81_v18, 0.0 }
  0x9b   :  { %85 = vst.msk [vmem:[%s175_s3] sm:$0xff] %vm35_vm0, %v83_v19 }
  0x9e   :  { %v76_v20 = vld [vmem:[#allocation2 + $0x8] sm:$0xff] }
  0x9f   :  { %v82_v21 = vadd.f32 %v97_v14, %v76_v20 }
  0xa1   :  { %v84_v22 = vmax.f32 %v82_v21, 0.0 }
  0xa3   :  { %86 = vst.msk [vmem:[%s175_s3 + $0x8] sm:$0xff] %vm35_vm0, %v84_v22 }
  0xa4   :  { %91 = vsyncpa [#allocation4], 1 }

// kernel: transformer_encoder.18
= control target key start
LH: loop header
LB: loop body
LE: loop exit
PB: predicated region body
PF: predicated region fallthrough
CT: control target
= control target key end

     0   :  { %11 = vsyncpa [#allocation4], 0  ;;  %s206_s24 = smov [#allocation3]   ;;  %s207_s26 = smov 128   ;;  %s287_s0 = inlined_call_operand.vmem [shape: f32[16,32], index: 0, kind: input, shape index: {}]   ;;  %s288_s1 = inlined_call_operand.hbm [shape: f32[32,32], index: 1, kind: input, shape index: {}]   ;;  %s289_s2 = inlined_call_operand.vmem [shape: f32[1,32], index: 2, kind: input, shape index: {}]   ;;  %s290_s3 = inlined_call_operand.vmem [shape: f32[16,32], index: 3, kind: input, shape index: {}]   ;;  %s291_s4 = inlined_call_operand.vmem [shape: f32[1,32], index: 4, kind: input, shape index: {}]   ;;  %s292_s5 = inlined_call_operand.vmem [shape: f32[1,32], index: 5, kind: input, shape index: {}]   ;;  %s293_s6 = inlined_call_operand.vmem [shape: f32[16,32], index: 6, kind: output, shape index: {}]  }
   0x1   :  { %s18_s23 = sshll.u32 %s288_s1, 4  ;;  %s20_s25 = sshll.u32 %s206_s24, 4  ;;  %s19_s23 = int_to_ptr.hbm [resolvable:$true] %s18_s23  ;;  %s21_s25 = int_to_ptr.vmem [resolvable:$true] %s20_s25 }
   0x2   :  { %s208_s27 = smov 8  }
   0x3   :  { %26 = dma.hbm_to_vmem [thread:$0]  %s19_s23, 512, %s21_s25, [#allocation4], %s207_s26, %s207_s26, %s208_s27  }
   0x4   :  { %204 = dma.done.wait [#allocation4], 512  }
   0x5   :  { %205 = vsyncadd [#allocation4], 4294966784  ;;  %vm44_vm0 = vcmask 261120   ;;  %v209_v0 = vmov 0.0   ;;  %v54_v1 = vld [vmem:[#allocation3 + $0x10] sm:$0xff]  ;;  %v55_v2 = vld [vmem:[#allocation3 + $0x18] sm:$0xff] }
   0x6   :  { %45 = vst.msk [vmem:[#allocation2] sm:$0xff] %vm44_vm0, %v209_v0  ;;  %v52_v3 = vld [vmem:[#allocation3] sm:$0xff]  ;;  %v57_v4 = vpack.c.bf16 %v55_v2, %v54_v1  ;;  %v53_v5 = vld [vmem:[#allocation3 + $0x8] sm:$0xff]  ;;  %v49_v7 = vld [vmem:[%s287_s0] sm:$0xff]  ;;  %v210_v27 = vmov 32.0  }
   0x7   :  { %46 = vst.msk [vmem:[#allocation2 + $0x8] sm:$0xff] %vm44_vm0, %v209_v0  ;;  %v56_v6 = vpack.c.bf16 %v53_v5, %v52_v3  ;;  %v50_v8 = vld [vmem:[%s287_s0 + $0x8] sm:$0xff]  ;;  %v171_v14 = vld [vmem:[%s289_s2] ss:$0 sm:$0xff]  ;;  %174 = vrcp.f32 %v210_v27 }
   0x8   :  { %68 = vmatpush.bf16.msra.mxu0 %v57_v4  ;;  %v51_v9 = vpack.c.bf16 %v50_v8, %v49_v7  ;;  %v91_v18 = vld [vmem:[%s290_s3] sm:$0xff]  ;;  %v92_v23 = vld [vmem:[%s290_s3 + $0x8] sm:$0xff] }
   0x9   :  { %v172_v58 = vld [vmem:[%s291_s4] ss:$0 sm:$0xff] }
   0xa   :  { %v173_v61 = vld [vmem:[%s292_s5] ss:$0 sm:$0xff] }
   0xc   :  { %69 = vmatpush.bf16.msra.mxu0 %v56_v6 }
   0xd   :  { %v47_v10 = vld [vmem:[#allocation2] sm:$0xff]  ;;  %v175_v28 = vpop.eup %174 }
   0xe   :  { %v48_v13 = vld [vmem:[#allocation2 + $0x8] sm:$0xff]  ;;  %v102_v29 = vmul.f32 32.0, %v175_v28  ;;  %vm106_vm1 = vweird.f32 %v175_v28 }
   0xf   :  { %165 = vmatmul.msk.bf16.vlgmr.msra.gmra.mxu0 %vm44_vm0, %v51_v9 }
  0x10   :  { %v103_v30 = vsub.f32 1.0, %v102_v29 }
  0x12   :  { %v104_v31 = vmul.f32 %v175_v28, %v103_v30 }
  0x14   :  { %v105_v32 = vadd.f32 %v175_v28, %v104_v31 }
  0x16   :  { %v107_v33 = vsel %vm106_vm1, %v175_v28, %v105_v32 }
  0x8c   :  { %v71_v11 = vpop.f32.mrf.mxu0 }
  0x8d   :  { %v76_v12 = vadd.f32 %v71_v11, %v47_v10 }
  0x8f   :  { %78 = vst.msk [vmem:[#allocation2] sm:$0xff] %vm44_vm0, %v76_v12 }
  0x94   :  { %v73_v15 = vpop.f32.mrf.mxu0 }
  0x95   :  { %v77_v16 = vadd.f32 %v73_v15, %v48_v13 }
  0x96   :  { %v83_v17 = vld [vmem:[#allocation2] sm:$0xff] }
  0x97   :  { %79 = vst.msk [vmem:[#allocation2 + $0x8] sm:$0xff] %vm44_vm0, %v77_v16  ;;  %v89_v19 = vadd.f32 %v171_v14, %v83_v17 }
  0x99   :  { %v93_v20 = vadd.f32 %v91_v18, %v89_v19 }
  0x9b   :  { %v95_v21 = vsel %vm44_vm0, %v93_v20, 0.0 }
  0x9c   :  { %96 = vadd.xlane.f32.xlu0 %v95_v21 }
  0x9e   :  { %v84_v22 = vld [vmem:[#allocation2 + $0x8] sm:$0xff] }
  0x9f   :  { %v90_v24 = vadd.f32 %v171_v14, %v84_v22 }
  0xa1   :  { %v94_v25 = vadd.f32 %v92_v23, %v90_v24 }
  0xa3   :  { %v98_v26 = vsel %vm44_vm0, %v94_v25, 0.0 }
  0xa4   :  { %99 = vadd.xlane.f32.xlu0 %v98_v26 }
 0x10f   :  { %v97_v34 = vpop.xlane.xlu0 %96 }
 0x110   :  { %v108_v35 = vmul.f32 %v107_v33, %v97_v34 }
 0x112   :  { %v110_v36 = vsub.f32 %v93_v20, %v108_v35 }
 0x114   :  { %v112_v37 = vmul.f32 %v110_v36, %v110_v36 }
 0x116   :  { %v114_v38 = vsel %vm44_vm0, %v112_v37, 0.0 }
 0x117   :  { %115 = vadd.xlane.f32.xlu1 %v114_v38  ;;  %v100_v39 = vpop.xlane.xlu0 %99 }
 0x118   :  { %v109_v40 = vmul.f32 %v107_v33, %v100_v39 }
 0x11a   :  { %v111_v41 = vsub.f32 %v94_v25, %v109_v40 }
 0x11c   :  { %v113_v42 = vmul.f32 %v111_v41, %v111_v41 }
 0x11e   :  { %v117_v43 = vsel %vm44_vm0, %v113_v42, 0.0 }
 0x11f   :  { %118 = vadd.xlane.f32.xlu1 %v117_v43 }
 0x18a   :  { %v116_v44 = vpop.xlane.xlu1 %115 }
 0x18b   :  { %v120_v45 = vmul.f32 %v116_v44, %v107_v33 }
 0x18d   :  { %v122_v46 = vadd.f32 1e-05, %v120_v45 }
 0x18f   :  { %176 = vrsqrt.f32 %v122_v46  ;;  %vm130_vm3 = vweird.f32 %v122_v46 }
 0x192   :  { %v119_v47 = vpop.xlane.xlu1 %118 }
 0x193   :  { %v121_v48 = vmul.f32 %v119_v47, %v107_v33 }
 0x195   :  { %v177_v49 = vpop.eup %176  ;;  %v123_v50 = vadd.f32 1e-05, %v121_v48 }
 0x196   :  { %v125_v51 = vmul.f32 %v177_v49, %v122_v46  ;;  %vm131_vm2 = vweird.f32 %v177_v49 }
 0x197   :  { %178 = vrsqrt.f32 %v123_v50  ;;  %vm132_vm4 = vmor %vm130_vm3, %vm131_vm2  ;;  %vm140_vm6 = vweird.f32 %v123_v50 }
 0x198   :  { %v126_v52 = vmul.f32 %v177_v49, %v125_v51 }
 0x19a   :  { %v127_v53 = vmul.f32 0.5, %v126_v52 }
 0x19c   :  { %v128_v54 = vsub.f32 1.5, %v127_v53 }
 0x19d   :  { %v179_v55 = vpop.eup %178 }
 0x19e   :  { %v129_v56 = vmul.f32 %v177_v49, %v128_v54  ;;  %v135_v57 = vmul.f32 %v179_v55, %v123_v50  ;;  %vm141_vm5 = vweird.f32 %v179_v55 }
 0x19f   :  { %vm142_vm7 = vmor %vm140_vm6, %vm141_vm5 }
 0x1a0   :  { %v133_v59 = vsel %vm132_vm4, %v177_v49, %v129_v56  ;;  %v136_v60 = vmul.f32 %v179_v55, %v135_v57 }
 0x1a1   :  { %v144_v62 = vmul.f32 %v133_v59, %v110_v36 }
 0x1a2   :  { %v137_v63 = vmul.f32 0.5, %v136_v60 }
 0x1a3   :  { %v150_v0 = vmul.f32 %v172_v58, %v144_v62 }
 0x1a4   :  { %v138_v1 = vsub.f32 1.5, %v137_v63 }
 0x1a5   :  { %v156_v2 = vadd.f32 %v173_v61, %v150_v0 }
 0x1a6   :  { %v139_v3 = vmul.f32 %v179_v55, %v138_v1 }
 0x1a7   :  { %158 = vst.msk [vmem:[%s293_s6] sm:$0xff] %vm44_vm0, %v156_v2 }
 0x1a8   :  { %v143_v4 = vsel %vm142_vm7, %v179_v55, %v139_v3 }
 0x1a9   :  { %v145_v5 = vmul.f32 %v143_v4, %v111_v41 }
 0x1ab   :  { %v151_v6 = vmul.f32 %v172_v58, %v145_v5 }
 0x1ad   :  { %v157_v7 = vadd.f32 %v173_v61, %v151_v6 }
 0x1af   :  { %159 = vst.msk [vmem:[%s293_s6 + $0x8] sm:$0xff] %vm44_vm0, %v157_v7 }
 0x1b0   :  { %164 = vsyncpa [#allocation4], 1 }

// kernel: transformer_encoder.20
= control target key start
LH: loop header
LB: loop body
LE: loop exit
PB: predicated region body
PF: predicated region fallthrough
CT: control target
= control target key end

     0   :  { %vm28_vm0 = vcmask 261120   ;;  %v167_v3 = vmov 0.0   ;;  %vm48_vm1 = vcmask 523264   ;;  %v168_v33 = vmov 32.0   ;;  %s265_s1 = inlined_call_operand.vmem [shape: f32[64,32], index: 1, kind: input, shape index: {}]   ;;  %s266_s0 = inlined_call_operand.vmem [shape: f32[16,64], index: 0, kind: input, shape index: {}]   ;;  %s267_s2 = inlined_call_operand.vmem [shape: f32[1,32], index: 2, kind: input, shape index: {}]   ;;  %s268_s3 = inlined_call_operand.vmem [shape: f32[16,32], index: 3, kind: input, shape index: {}]   ;;  %s269_s4 = inlined_call_operand.vmem [shape: f32[1,32], index: 4, kind: input, shape index: {}]   ;;  %s270_s5 = inlined_call_operand.vmem [shape: f32[1,32], index: 5, kind: input, shape index: {}]   ;;  %s271_s6 = inlined_call_operand.vmem [shape: f32[16,32], index: 6, kind: output, shape index: {}]  }
   0x1   :  { %v42_v0 = vld [vmem:[%s265_s1 + $0x30] sm:$0xff]  ;;  %v43_v1 = vld [vmem:[%s265_s1 + $0x38] sm:$0xff]  ;;  %v40_v2 = vld [vmem:[%s265_s1 + $0x20] sm:$0xff]  ;;  %29 = vst.msk [vmem:[#allocation2] sm:$0xff] %vm28_vm0, %v167_v3  ;;  %161 = vrcp.f32 %v168_v33 }
   0x2   :  { %v47_v4 = vpack.c.bf16 %v43_v1, %v42_v0  ;;  %v41_v5 = vld [vmem:[%s265_s1 + $0x28] sm:$0xff]  ;;  %30 = vst.msk [vmem:[#allocation2 + $0x8] sm:$0xff] %vm28_vm0, %v167_v3  ;;  %v38_v7 = vld [vmem:[%s265_s1 + $0x10] sm:$0xff]  ;;  %v39_v8 = vld [vmem:[%s265_s1 + $0x18] sm:$0xff] }
   0x3   :  { %v46_v6 = vpack.c.bf16 %v41_v5, %v40_v2  ;;  %v45_v9 = vpack.c.bf16 %v39_v8, %v38_v7  ;;  %v36_v10 = vld [vmem:[%s265_s1] sm:$0xff]  ;;  %v37_v11 = vld [vmem:[%s265_s1 + $0x8] sm:$0xff] }
   0x4   :  { %56 = vmatpush.bf16.msra.mxu0 %v47_v4  ;;  %v44_v12 = vpack.c.bf16 %v37_v11, %v36_v10  ;;  %v33_v13 = vld [vmem:[%s266_s0] sm:$0xff]  ;;  %v34_v14 = vld [vmem:[%s266_s0 + $0x8] sm:$0xff] }
   0x5   :  { %v35_v15 = vpack.c.bf16 %v34_v14, %v33_v13  ;;  %v158_v20 = vld [vmem:[%s267_s2] ss:$0 sm:$0xff]  ;;  %v83_v29 = vld [vmem:[%s268_s3 + $0x8] sm:$0xff] }
   0x6   :  { %v82_v24 = vld [vmem:[%s268_s3] sm:$0xff] }
   0x7   :  { %v162_v34 = vpop.eup %161  ;;  %v159_v0 = vld [vmem:[%s269_s4] ss:$0 sm:$0xff] }
   0x8   :  { %57 = vmatpush.bf16.msra.mxu0 %v46_v6  ;;  %v31_v16 = vld [vmem:[#allocation2] sm:$0xff]  ;;  %v93_v35 = vmul.f32 32.0, %v162_v34  ;;  %vm97_vm2 = vweird.f32 %v162_v34 }
   0x9   :  { %v32_v19 = vld [vmem:[#allocation2 + $0x8] sm:$0xff]  ;;  %v160_v3 = vld [vmem:[%s270_s5] ss:$0 sm:$0xff] }
   0xa   :  { %v94_v36 = vsub.f32 1.0, %v93_v35 }
   0xc   :  { %58 = vmatpush.bf16.msra.mxu0 %v45_v9  ;;  %v95_v37 = vmul.f32 %v162_v34, %v94_v36 }
   0xe   :  { %v96_v38 = vadd.f32 %v162_v34, %v95_v37 }
  0x10   :  { %59 = vmatpush.bf16.msra.mxu0 %v44_v12  ;;  %v98_v39 = vsel %vm97_vm2, %v162_v34, %v96_v38 }
  0x13   :  { %155 = vmatmul.msk.bf16.vlgmr.msra.gmra.mxu0 %vm48_vm1, %v35_v15 }
  0x90   :  { %v61_v17 = vpop.f32.mrf.mxu0 }
  0x91   :  { %v66_v18 = vadd.f32 %v61_v17, %v31_v16 }
  0x93   :  { %69 = vst.msk [vmem:[#allocation2] sm:$0xff] %vm28_vm0, %v66_v18 }
  0x98   :  { %v63_v21 = vpop.f32.mrf.mxu0 }
  0x99   :  { %v67_v22 = vadd.f32 %v63_v21, %v32_v19 }
  0x9a   :  { %v74_v23 = vld [vmem:[#allocation2] sm:$0xff] }
  0x9b   :  { %70 = vst.msk [vmem:[#allocation2 + $0x8] sm:$0xff] %vm28_vm0, %v67_v22  ;;  %v80_v25 = vadd.f32 %v158_v20, %v74_v23 }
  0x9d   :  { %v84_v26 = vadd.f32 %v82_v24, %v80_v25 }
  0x9f   :  { %v86_v27 = vsel %vm28_vm0, %v84_v26, 0.0 }
  0xa0   :  { %87 = vadd.xlane.f32.xlu0 %v86_v27 }
  0xa2   :  { %v75_v28 = vld [vmem:[#allocation2 + $0x8] sm:$0xff] }
  0xa3   :  { %v81_v30 = vadd.f32 %v158_v20, %v75_v28 }
  0xa5   :  { %v85_v31 = vadd.f32 %v83_v29, %v81_v30 }
  0xa7   :  { %v89_v32 = vsel %vm28_vm0, %v85_v31, 0.0 }
  0xa8   :  { %90 = vadd.xlane.f32.xlu0 %v89_v32 }
 0x113   :  { %v88_v40 = vpop.xlane.xlu0 %87 }
 0x114   :  { %v99_v41 = vmul.f32 %v98_v39, %v88_v40 }
 0x116   :  { %v101_v42 = vsub.f32 %v84_v26, %v99_v41 }
 0x118   :  { %v103_v43 = vmul.f32 %v101_v42, %v101_v42 }
 0x11a   :  { %v105_v44 = vsel %vm28_vm0, %v103_v43, 0.0 }
 0x11b   :  { %106 = vadd.xlane.f32.xlu1 %v105_v44  ;;  %v91_v45 = vpop.xlane.xlu0 %90 }
 0x11c   :  { %v100_v46 = vmul.f32 %v98_v39, %v91_v45 }
 0x11e   :  { %v102_v47 = vsub.f32 %v85_v31, %v100_v46 }
 0x120   :  { %v104_v48 = vmul.f32 %v102_v47, %v102_v47 }
 0x122   :  { %v108_v49 = vsel %vm28_vm0, %v104_v48, 0.0 }
 0x123   :  { %109 = vadd.xlane.f32.xlu1 %v108_v49 }
 0x18e   :  { %v107_v50 = vpop.xlane.xlu1 %106 }
 0x18f   :  { %v111_v51 = vmul.f32 %v107_v50, %v98_v39 }
 0x191   :  { %v113_v52 = vadd.f32 1e-05, %v111_v51 }
 0x193   :  { %163 = vrsqrt.f32 %v113_v52  ;;  %vm121_vm4 = vweird.f32 %v113_v52 }
 0x196   :  { %v110_v53 = vpop.xlane.xlu1 %109 }
 0x197   :  { %v112_v54 = vmul.f32 %v110_v53, %v98_v39 }
 0x199   :  { %v164_v55 = vpop.eup %163  ;;  %v114_v56 = vadd.f32 1e-05, %v112_v54 }
 0x19a   :  { %v116_v57 = vmul.f32 %v164_v55, %v113_v52  ;;  %vm122_vm3 = vweird.f32 %v164_v55 }
 0x19b   :  { %165 = vrsqrt.f32 %v114_v56  ;;  %vm123_vm5 = vmor %vm121_vm4, %vm122_vm3  ;;  %vm131_vm7 = vweird.f32 %v114_v56 }
 0x19c   :  { %v117_v58 = vmul.f32 %v164_v55, %v116_v57 }
 0x19e   :  { %v118_v59 = vmul.f32 0.5, %v117_v58 }
 0x1a0   :  { %v119_v60 = vsub.f32 1.5, %v118_v59 }
 0x1a1   :  { %v166_v61 = vpop.eup %165 }
 0x1a2   :  { %v120_v62 = vmul.f32 %v164_v55, %v119_v60  ;;  %v126_v63 = vmul.f32 %v166_v61, %v114_v56  ;;  %vm132_vm6 = vweird.f32 %v166_v61 }
 0x1a3   :  { %vm133_vm8 = vmor %vm131_vm7, %vm132_vm6 }
 0x1a4   :  { %v124_v1 = vsel %vm123_vm5, %v164_v55, %v120_v62  ;;  %v127_v2 = vmul.f32 %v166_v61, %v126_v63 }
 0x1a5   :  { %v135_v4 = vmul.f32 %v124_v1, %v101_v42 }
 0x1a6   :  { %v128_v5 = vmul.f32 0.5, %v127_v2 }
 0x1a7   :  { %v141_v6 = vmul.f32 %v159_v0, %v135_v4 }
 0x1a8   :  { %v129_v7 = vsub.f32 1.5, %v128_v5 }
 0x1a9   :  { %v147_v8 = vadd.f32 %v160_v3, %v141_v6 }
 0x1aa   :  { %v130_v9 = vmul.f32 %v166_v61, %v129_v7 }
 0x1ab   :  { %149 = vst.msk [vmem:[%s271_s6] sm:$0xff] %vm28_vm0, %v147_v8 }
 0x1ac   :  { %v134_v10 = vsel %vm133_vm8, %v166_v61, %v130_v9 }
 0x1ad   :  { %v136_v11 = vmul.f32 %v134_v10, %v102_v47 }
 0x1af   :  { %v142_v12 = vmul.f32 %v159_v0, %v136_v11 }
 0x1b1   :  { %v148_v13 = vadd.f32 %v160_v3, %v142_v12 }
 0x1b3   :  { %150 = vst.msk [vmem:[%s271_s6 + $0x8] sm:$0xff] %vm28_vm0, %v148_v13 }

// kernel: transformer_encoder.21
= control target key start
LH: loop header
LB: loop body
LE: loop exit
PB: predicated region body
PF: predicated region fallthrough
CT: control target
= control target key end

     0   :  { %vm19_vm0 = vcmask 261120   ;;  %v75_v3 = vmov 0.0   ;;  %s130_s1 = inlined_call_operand.vmem [shape: f32[32,32], index: 1, kind: input, shape index: {}]   ;;  %s131_s0 = inlined_call_operand.vmem [shape: f32[16,32], index: 0, kind: input, shape index: {}]   ;;  %s132_s2 = inlined_call_operand.vmem [shape: f32[1,32], index: 2, kind: input, shape index: {}]   ;;  %s133_s3 = inlined_call_operand.vmem [shape: f32[16,32], index: 3, kind: output, shape index: {}]  }
   0x1   :  { %v29_v0 = vld [vmem:[%s130_s1 + $0x10] sm:$0xff]  ;;  %v30_v1 = vld [vmem:[%s130_s1 + $0x18] sm:$0xff]  ;;  %v27_v2 = vld [vmem:[%s130_s1] sm:$0xff]  ;;  %20 = vst.msk [vmem:[#allocation2] sm:$0xff] %vm19_vm0, %v75_v3 }
   0x2   :  { %v32_v4 = vpack.c.bf16 %v30_v1, %v29_v0  ;;  %v28_v5 = vld [vmem:[%s130_s1 + $0x8] sm:$0xff]  ;;  %21 = vst.msk [vmem:[#allocation2 + $0x8] sm:$0xff] %vm19_vm0, %v75_v3  ;;  %v24_v7 = vld [vmem:[%s131_s0] sm:$0xff] }
   0x3   :  { %v31_v6 = vpack.c.bf16 %v28_v5, %v27_v2  ;;  %v25_v8 = vld [vmem:[%s131_s0 + $0x8] sm:$0xff]  ;;  %v74_v14 = vld [vmem:[%s132_s2] ss:$0 sm:$0xff] }
   0x4   :  { %43 = vmatpush.bf16.msra.mxu0 %v32_v4  ;;  %v26_v9 = vpack.c.bf16 %v25_v8, %v24_v7 }
   0x8   :  { %44 = vmatpush.bf16.msra.mxu0 %v31_v6  ;;  %v22_v10 = vld [vmem:[#allocation2] sm:$0xff] }
   0x9   :  { %v23_v13 = vld [vmem:[#allocation2 + $0x8] sm:$0xff] }
   0xb   :  { %72 = vmatmul.msk.bf16.vlgmr.msra.gmra.mxu0 %vm19_vm0, %v26_v9 }
  0x88   :  { %v46_v11 = vpop.f32.mrf.mxu0 }
  0x89   :  { %v51_v12 = vadd.f32 %v46_v11, %v22_v10 }
  0x8b   :  { %53 = vst.msk [vmem:[#allocation2] sm:$0xff] %vm19_vm0, %v51_v12 }
  0x90   :  { %v48_v15 = vpop.f32.mrf.mxu0 }
  0x91   :  { %v52_v16 = vadd.f32 %v48_v15, %v23_v13 }
  0x92   :  { %v58_v17 = vld [vmem:[#allocation2] sm:$0xff] }
  0x93   :  { %v64_v18 = vadd.f32 %v74_v14, %v58_v17  ;;  %54 = vst.msk [vmem:[#allocation2 + $0x8] sm:$0xff] %vm19_vm0, %v52_v16 }
  0x95   :  { %66 = vst.msk [vmem:[%s133_s3] sm:$0xff] %vm19_vm0, %v64_v18 }
  0x9a   :  { %v59_v19 = vld [vmem:[#allocation2 + $0x8] sm:$0xff] }
  0x9b   :  { %v65_v20 = vadd.f32 %v74_v14, %v59_v19 }
  0x9d   :  { %67 = vst.msk [vmem:[%s133_s3 + $0x8] sm:$0xff] %vm19_vm0, %v65_v20 }

// kernel: transformer_encoder.27
= control target key start
LH: loop header
LB: loop body
LE: loop exit
PB: predicated region body
PF: predicated region fallthrough
CT: control target
= control target key end

     0   :  { %vm17_vm0 = vcmask 261120   ;;  %s184_s0 = inlined_call_operand.vmem [shape: f32[16,32], index: 0, kind: input, shape index: {}]   ;;  %s185_s1 = inlined_call_operand.vmem [shape: f32[1,32], index: 1, kind: input, shape index: {}]   ;;  %s186_s2 = inlined_call_operand.vmem [shape: f32[1,32], index: 2, kind: input, shape index: {}]   ;;  %s187_s3 = inlined_call_operand.hbm [shape: f32[16,32], index: 3, kind: output, shape index: {}]  }
   0x1   :  { %v15_v0 = vld [vmem:[%s184_s0] sm:$0xff] }
   0x2   :  { %v18_v1 = vsel %vm17_vm0, %v15_v0, 0.0 }
   0x3   :  { %8 = vsyncpa [#allocation3], 0  ;;  %19 = vadd.xlane.f32.xlu0 %v18_v1  ;;  %v16_v2 = vld [vmem:[%s184_s0 + $0x8] sm:$0xff]  ;;  %v139_v4 = vmov 32.0   ;;  %v105_v35 = vld [vmem:[%s185_s1] ss:$0 sm:$0xff] }
   0x4   :  { %v21_v3 = vsel %vm17_vm0, %v16_v2, 0.0  ;;  %107 = vrcp.f32 %v139_v4  ;;  %v106_v39 = vld [vmem:[%s186_s2] ss:$0 sm:$0xff]  ;;  %s140_s1 = smov [#allocation2]   ;;  %s89_s22 = sshll.u32 %s187_s3, 4  ;;  %s90_s22 = int_to_ptr.hbm [resolvable:$true] %s89_s22 }
   0x5   :  { %s87_s19 = sshll.u32 %s140_s1, 4  ;;  %s141_s2 = smov 128   ;;  %s88_s19 = int_to_ptr.vmem [resolvable:$true] %s87_s19 }
   0x6   :  { %s142_s23 = smov 8  }
   0xa   :  { %v108_v5 = vpop.eup %107 }
   0xb   :  { %22 = vadd.xlane.f32.xlu0 %v21_v3  ;;  %v25_v6 = vmul.f32 32.0, %v108_v5  ;;  %vm29_vm1 = vweird.f32 %v108_v5 }
   0xd   :  { %v26_v7 = vsub.f32 1.0, %v25_v6 }
   0xf   :  { %v27_v8 = vmul.f32 %v108_v5, %v26_v7 }
  0x11   :  { %v28_v9 = vadd.f32 %v108_v5, %v27_v8 }
  0x13   :  { %v30_v10 = vsel %vm29_vm1, %v108_v5, %v28_v9 }
  0x76   :  { %v20_v11 = vpop.xlane.xlu0 %19 }
  0x77   :  { %v31_v12 = vmul.f32 %v30_v10, %v20_v11 }
  0x79   :  { %v33_v13 = vsub.f32 %v15_v0, %v31_v12 }
  0x7b   :  { %v35_v14 = vmul.f32 %v33_v13, %v33_v13 }
  0x7d   :  { %v37_v15 = vsel %vm17_vm0, %v35_v14, 0.0 }
  0x7e   :  { %38 = vadd.xlane.f32.xlu1 %v37_v15  ;;  %v23_v16 = vpop.xlane.xlu0 %22 }
  0x7f   :  { %v32_v17 = vmul.f32 %v30_v10, %v23_v16 }
  0x81   :  { %v34_v18 = vsub.f32 %v16_v2, %v32_v17 }
  0x83   :  { %v36_v19 = vmul.f32 %v34_v18, %v34_v18 }
  0x85   :  { %v40_v20 = vsel %vm17_vm0, %v36_v19, 0.0 }
  0x86   :  { %41 = vadd.xlane.f32.xlu1 %v40_v20 }
  0xf1   :  { %v39_v21 = vpop.xlane.xlu1 %38 }
  0xf2   :  { %v43_v22 = vmul.f32 %v39_v21, %v30_v10 }
  0xf4   :  { %v45_v23 = vadd.f32 1e-05, %v43_v22 }
  0xf6   :  { %109 = vrsqrt.f32 %v45_v23  ;;  %vm53_vm3 = vweird.f32 %v45_v23 }
  0xf9   :  { %v42_v24 = vpop.xlane.xlu1 %41 }
  0xfa   :  { %v44_v25 = vmul.f32 %v42_v24, %v30_v10 }
  0xfc   :  { %v110_v26 = vpop.eup %109  ;;  %v46_v27 = vadd.f32 1e-05, %v44_v25 }
  0xfd   :  { %v48_v28 = vmul.f32 %v110_v26, %v45_v23  ;;  %vm54_vm2 = vweird.f32 %v110_v26 }
  0xfe   :  { %111 = vrsqrt.f32 %v46_v27  ;;  %vm55_vm4 = vmor %vm53_vm3, %vm54_vm2  ;;  %vm63_vm6 = vweird.f32 %v46_v27 }
  0xff   :  { %v49_v29 = vmul.f32 %v110_v26, %v48_v28 }
 0x101   :  { %v50_v30 = vmul.f32 0.5, %v49_v29 }
 0x103   :  { %v51_v31 = vsub.f32 1.5, %v50_v30 }
 0x104   :  { %v112_v32 = vpop.eup %111 }
 0x105   :  { %v52_v33 = vmul.f32 %v110_v26, %v51_v31  ;;  %v58_v34 = vmul.f32 %v112_v32, %v46_v27  ;;  %vm64_vm5 = vweird.f32 %v112_v32 }
 0x106   :  { %vm65_vm7 = vmor %vm63_vm6, %vm64_vm5 }
 0x107   :  { %v56_v36 = vsel %vm55_vm4, %v110_v26, %v52_v33  ;;  %v59_v37 = vmul.f32 %v112_v32, %v58_v34 }
 0x108   :  { %v67_v38 = vmul.f32 %v56_v36, %v33_v13 }
 0x109   :  { %v60_v40 = vmul.f32 0.5, %v59_v37 }
 0x10a   :  { %v73_v41 = vmul.f32 %v105_v35, %v67_v38 }
 0x10b   :  { %v61_v42 = vsub.f32 1.5, %v60_v40 }
 0x10c   :  { %v79_v43 = vadd.f32 %v106_v39, %v73_v41 }
 0x10d   :  { %v62_v44 = vmul.f32 %v112_v32, %v61_v42 }
 0x10e   :  { %81 = vst.msk [vmem:[#allocation2] sm:$0xff] %vm17_vm0, %v79_v43 }
 0x10f   :  { %v66_v45 = vsel %vm65_vm7, %v112_v32, %v62_v44 }
 0x110   :  { %v68_v46 = vmul.f32 %v66_v45, %v34_v18 }
 0x112   :  { %v74_v47 = vmul.f32 %v105_v35, %v68_v46 }
 0x114   :  { %v80_v48 = vadd.f32 %v106_v39, %v74_v47 }
 0x116   :  { %82 = vst.msk [vmem:[#allocation2 + $0x8] sm:$0xff] %vm17_vm0, %v80_v48 }
 0x117   :  { %95 = dma.vmem_to_hbm [thread:$0]  %s88_s19, 256, %s90_s22, [#allocation3], %s141_s2, %s141_s2, %s142_s23  }
 0x118   :  { %137 = dma.done.wait [#allocation3], 256  }
 0x119   :  { %138 = vsyncadd [#allocation3], 4294967040 }
 0x11a   :  { %100 = vsyncpa [#allocation3], 1 }

// kernel: transformer_encoder.24
= control target key start
LH: loop header
LB: loop body
LE: loop exit
PB: predicated region body
PF: predicated region fallthrough
CT: control target
= control target key end

     0   :  { %vm28_vm0 = vcmask 261120   ;;  %v160_v3 = vmov 0.0   ;;  %v161_v27 = vmov 32.0   ;;  %s247_s1 = inlined_call_operand.vmem [shape: f32[32,32], index: 1, kind: input, shape index: {}]   ;;  %s248_s0 = inlined_call_operand.vmem [shape: f32[16,32], index: 0, kind: input, shape index: {}]   ;;  %s249_s2 = inlined_call_operand.vmem [shape: f32[1,32], index: 2, kind: input, shape index: {}]   ;;  %s250_s3 = inlined_call_operand.vmem [shape: f32[16,32], index: 3, kind: input, shape index: {}]   ;;  %s251_s4 = inlined_call_operand.vmem [shape: f32[1,32], index: 4, kind: input, shape index: {}]   ;;  %s252_s5 = inlined_call_operand.vmem [shape: f32[1,32], index: 5, kind: input, shape index: {}]   ;;  %s253_s6 = inlined_call_operand.vmem [shape: f32[16,32], index: 6, kind: output, shape index: {}]  }
   0x1   :  { %v38_v0 = vld [vmem:[%s247_s1 + $0x10] sm:$0xff]  ;;  %v39_v1 = vld [vmem:[%s247_s1 + $0x18] sm:$0xff]  ;;  %v36_v2 = vld [vmem:[%s247_s1] sm:$0xff]  ;;  %29 = vst.msk [vmem:[#allocation2] sm:$0xff] %vm28_vm0, %v160_v3  ;;  %154 = vrcp.f32 %v161_v27 }
   0x2   :  { %v41_v4 = vpack.c.bf16 %v39_v1, %v38_v0  ;;  %v37_v5 = vld [vmem:[%s247_s1 + $0x8] sm:$0xff]  ;;  %30 = vst.msk [vmem:[#allocation2 + $0x8] sm:$0xff] %vm28_vm0, %v160_v3  ;;  %v33_v7 = vld [vmem:[%s248_s0] sm:$0xff] }
   0x3   :  { %v40_v6 = vpack.c.bf16 %v37_v5, %v36_v2  ;;  %v34_v8 = vld [vmem:[%s248_s0 + $0x8] sm:$0xff]  ;;  %v151_v14 = vld [vmem:[%s249_s2] ss:$0 sm:$0xff] }
   0x4   :  { %52 = vmatpush.bf16.msra.mxu0 %v41_v4  ;;  %v35_v9 = vpack.c.bf16 %v34_v8, %v33_v7  ;;  %v75_v18 = vld [vmem:[%s250_s3] sm:$0xff]  ;;  %v76_v23 = vld [vmem:[%s250_s3 + $0x8] sm:$0xff] }
   0x5   :  { %v152_v58 = vld [vmem:[%s251_s4] ss:$0 sm:$0xff] }
   0x6   :  { %v153_v61 = vld [vmem:[%s252_s5] ss:$0 sm:$0xff] }
   0x7   :  { %v155_v28 = vpop.eup %154 }
   0x8   :  { %53 = vmatpush.bf16.msra.mxu0 %v40_v6  ;;  %v31_v10 = vld [vmem:[#allocation2] sm:$0xff]  ;;  %v86_v29 = vmul.f32 32.0, %v155_v28  ;;  %vm90_vm1 = vweird.f32 %v155_v28 }
   0x9   :  { %v32_v13 = vld [vmem:[#allocation2 + $0x8] sm:$0xff] }
   0xa   :  { %v87_v30 = vsub.f32 1.0, %v86_v29 }
   0xb   :  { %148 = vmatmul.msk.bf16.vlgmr.msra.gmra.mxu0 %vm28_vm0, %v35_v9 }
   0xc   :  { %v88_v31 = vmul.f32 %v155_v28, %v87_v30 }
   0xe   :  { %v89_v32 = vadd.f32 %v155_v28, %v88_v31 }
  0x10   :  { %v91_v33 = vsel %vm90_vm1, %v155_v28, %v89_v32 }
  0x88   :  { %v55_v11 = vpop.f32.mrf.mxu0 }
  0x89   :  { %v60_v12 = vadd.f32 %v55_v11, %v31_v10 }
  0x8b   :  { %62 = vst.msk [vmem:[#allocation2] sm:$0xff] %vm28_vm0, %v60_v12 }
  0x90   :  { %v57_v15 = vpop.f32.mrf.mxu0 }
  0x91   :  { %v61_v16 = vadd.f32 %v57_v15, %v32_v13 }
  0x92   :  { %v67_v17 = vld [vmem:[#allocation2] sm:$0xff] }
  0x93   :  { %63 = vst.msk [vmem:[#allocation2 + $0x8] sm:$0xff] %vm28_vm0, %v61_v16  ;;  %v73_v19 = vadd.f32 %v151_v14, %v67_v17 }
  0x95   :  { %v77_v20 = vadd.f32 %v75_v18, %v73_v19 }
  0x97   :  { %v79_v21 = vsel %vm28_vm0, %v77_v20, 0.0 }
  0x98   :  { %80 = vadd.xlane.f32.xlu0 %v79_v21 }
  0x9a   :  { %v68_v22 = vld [vmem:[#allocation2 + $0x8] sm:$0xff] }
  0x9b   :  { %v74_v24 = vadd.f32 %v151_v14, %v68_v22 }
  0x9d   :  { %v78_v25 = vadd.f32 %v76_v23, %v74_v24 }
  0x9f   :  { %v82_v26 = vsel %vm28_vm0, %v78_v25, 0.0 }
  0xa0   :  { %83 = vadd.xlane.f32.xlu0 %v82_v26 }
 0x10b   :  { %v81_v34 = vpop.xlane.xlu0 %80 }
 0x10c   :  { %v92_v35 = vmul.f32 %v91_v33, %v81_v34 }
 0x10e   :  { %v94_v36 = vsub.f32 %v77_v20, %v92_v35 }
 0x110   :  { %v96_v37 = vmul.f32 %v94_v36, %v94_v36 }
 0x112   :  { %v98_v38 = vsel %vm28_vm0, %v96_v37, 0.0 }
 0x113   :  { %99 = vadd.xlane.f32.xlu1 %v98_v38  ;;  %v84_v39 = vpop.xlane.xlu0 %83 }
 0x114   :  { %v93_v40 = vmul.f32 %v91_v33, %v84_v39 }
 0x116   :  { %v95_v41 = vsub.f32 %v78_v25, %v93_v40 }
 0x118   :  { %v97_v42 = vmul.f32 %v95_v41, %v95_v41 }
 0x11a   :  { %v101_v43 = vsel %vm28_vm0, %v97_v42, 0.0 }
 0x11b   :  { %102 = vadd.xlane.f32.xlu1 %v101_v43 }
 0x186   :  { %v100_v44 = vpop.xlane.xlu1 %99 }
 0x187   :  { %v104_v45 = vmul.f32 %v100_v44, %v91_v33 }
 0x189   :  { %v106_v46 = vadd.f32 1e-05, %v104_v45 }
 0x18b   :  { %156 = vrsqrt.f32 %v106_v46  ;;  %vm114_vm3 = vweird.f32 %v106_v46 }
 0x18e   :  { %v103_v47 = vpop.xlane.xlu1 %102 }
 0x18f   :  { %v105_v48 = vmul.f32 %v103_v47, %v91_v33 }
 0x191   :  { %v157_v49 = vpop.eup %156  ;;  %v107_v50 = vadd.f32 1e-05, %v105_v48 }
 0x192   :  { %v109_v51 = vmul.f32 %v157_v49, %v106_v46  ;;  %vm115_vm2 = vweird.f32 %v157_v49 }
 0x193   :  { %158 = vrsqrt.f32 %v107_v50  ;;  %vm116_vm4 = vmor %vm114_vm3, %vm115_vm2  ;;  %vm124_vm6 = vweird.f32 %v107_v50 }
 0x194   :  { %v110_v52 = vmul.f32 %v157_v49, %v109_v51 }
 0x196   :  { %v111_v53 = vmul.f32 0.5, %v110_v52 }
 0x198   :  { %v112_v54 = vsub.f32 1.5, %v111_v53 }
 0x199   :  { %v159_v55 = vpop.eup %158 }
 0x19a   :  { %v113_v56 = vmul.f32 %v157_v49, %v112_v54  ;;  %v119_v57 = vmul.f32 %v159_v55, %v107_v50  ;;  %vm125_vm5 = vweird.f32 %v159_v55 }
 0x19b   :  { %vm126_vm7 = vmor %vm124_vm6, %vm125_vm5 }
 0x19c   :  { %v117_v59 = vsel %vm116_vm4, %v157_v49, %v113_v56  ;;  %v120_v60 = vmul.f32 %v159_v55, %v119_v57 }
 0x19d   :  { %v128_v62 = vmul.f32 %v117_v59, %v94_v36 }
 0x19e   :  { %v121_v63 = vmul.f32 0.5, %v120_v60 }
 0x19f   :  { %v134_v0 = vmul.f32 %v152_v58, %v128_v62 }
 0x1a0   :  { %v122_v1 = vsub.f32 1.5, %v121_v63 }
 0x1a1   :  { %v140_v2 = vadd.f32 %v153_v61, %v134_v0 }
 0x1a2   :  { %v123_v3 = vmul.f32 %v159_v55, %v122_v1 }
 0x1a3   :  { %142 = vst.msk [vmem:[%s253_s6] sm:$0xff] %vm28_vm0, %v140_v2 }
 0x1a4   :  { %v127_v4 = vsel %vm126_vm7, %v159_v55, %v123_v3 }
 0x1a5   :  { %v129_v5 = vmul.f32 %v127_v4, %v95_v41 }
 0x1a7   :  { %v135_v6 = vmul.f32 %v152_v58, %v129_v5 }
 0x1a9   :  { %v141_v7 = vadd.f32 %v153_v61, %v135_v6 }
 0x1ab   :  { %143 = vst.msk [vmem:[%s253_s6 + $0x8] sm:$0xff] %vm28_vm0, %v141_v7 }

</bundles_post_ra>
